<compile_context>
chip_gen: v5e
topology: v5e:2x2
jax: 0.10.0
libtpu: 0.0.40
codegen_flags: <defaults>
</compile_context>

<pallas_src>
import jax
import jax.numpy as jnp
from jax.experimental import pallas as pl
from jax.experimental.pallas import tpu as pltpu

IMG = 224
PATCH = 56
STRIDE = 56
NPH = IMG // PATCH          # patch rows  = 4
NPW = IMG // PATCH          # patch cols  = 4
NB_PATCHES = NPH * NPW      # 16
CHANNELS = 3


def _patches_kernel(x_ref, o_ref):
    # x_ref: (1, C, PATCH, IMG)           one 56-row band, all channels
    # o_ref: (1, NPW, C, PATCH, PATCH)    the NPW patches that band produces
    band = x_ref[0]                                        # (C, PATCH, IMG)
    band = band.reshape(CHANNELS, PATCH, NPW, PATCH)       # (C, p, pw, p)
    o_ref[...] = jnp.transpose(band, (2, 0, 1, 3))[None]   # (1, pw, C, p, p)


def patches(x):
    """x: (B, 3, 224, 224) -> (B, 16, 3, 56, 56), same semantics as Patches.forward."""
    B, C, H, W = x.shape
    assert (C, H, W) == (CHANNELS, IMG, IMG)
    # NOTE: the (1, C, 56, 224) input block is valid for 32-bit dtypes
    # (56 % 8 == 0, 224 is the full width).  For bf16/int8 inputs, switch the
    # band height to the full 224 rows (whole channel) to satisfy packed tiling.
    # TODO(synk): add a bf16 path with full-height blocks if activations go sub-32-bit.
    assert x.dtype.itemsize == 4, "block shapes below assume a 32-bit dtype"

    out_shape = jax.ShapeDtypeStruct((B, NB_PATCHES, C, PATCH, PATCH), x.dtype)

    return pl.pallas_call(
        _patches_kernel,
        out_shape=out_shape,
        grid_spec=pltpu.PrefetchScalarGridSpec(
            num_scalar_prefetch=0,
            grid=(B, NPH),
            in_specs=[
                # one horizontal band of 56 rows, full width, all channels
                pl.BlockSpec((1, CHANNELS, PATCH, IMG), lambda b, ph: (b, 0, ph, 0)),
            ],
            # the NPW patches produced by that band, all channels, contiguous
            # in the (B, 16, 3, 56, 56) output layout
            out_specs=pl.BlockSpec(
                (1, NPW, CHANNELS, PATCH, PATCH), lambda b, ph: (b, ph, 0, 0, 0)
            ),
        ),
        compiler_params=pltpu.CompilerParams(
            dimension_semantics=("parallel", "parallel")
        ),
    )(x)


def _patches_ref(x):
    # pure-JAX reference mirroring unfold/unfold/permute/reshape
    B = x.shape[0]
    x = x.reshape(B, CHANNELS, NPH, PATCH, NPW, PATCH)       # (B,C,ph,p,pw,p)
    x = jnp.transpose(x, (0, 2, 4, 1, 3, 5))                 # (B,ph,pw,C,p,p)
    return x.reshape(B, NB_PATCHES, CHANNELS, PATCH, PATCH)


if __name__ == "__main__":
    key = jax.random.PRNGKey(0)
    # Patches.forward hardcodes 3 channels / 16 patches of 56, so the input
    # must be (B, 3, 224, 224).  Use a small batch.
    x = jax.random.normal(key, (2, CHANNELS, IMG, IMG), dtype=jnp.float32)

    out = patches(x)
    out = jax.block_until_ready(out)

    ref = _patches_ref(x)
    assert out.shape == (2, NB_PATCHES, CHANNELS, PATCH, PATCH)
    assert jnp.array_equal(out, ref)

    print("KERNEL_OK")
</pallas_src>

<mosaic_0001>
module attributes {stable_mosaic.version = 11 : i64} {
  func.func @_patches_kernel(%arg0: i32, %arg1: i32, %arg2: memref<1x3x56x224xf32, #tpu.memory_space<vmem>>, %arg3: memref<1x4x3x56x56xf32, #tpu.memory_space<vmem>>) attributes {dimension_semantics = [#tpu.dimension_semantics<parallel>, #tpu.dimension_semantics<parallel>], iteration_bounds = array<i64: 2, 4>, scalar_prefetch = 0 : i64, scratch_operands = 0 : i64, tpu.core_type = #tpu.core_type<tc>, window_params = [{transform_indices = @transform_0, window_bounds = array<i64: 1, 3, 56, 224>}, {transform_indices = @transform_1, window_bounds = array<i64: 1, 4, 3, 56, 56>}]} {
    %c0 = arith.constant 0 : index
    %c0_0 = arith.constant 0 : index
    %c0_1 = arith.constant 0 : index
    %c0_2 = arith.constant 0 : index
    %0 = vector.load %arg2[%c0, %c0_0, %c0_1, %c0_2] : memref<1x3x56x224xf32, #tpu.memory_space<vmem>>, vector<1x3x56x224xf32>
    %1 = vector.shape_cast %0 : vector<1x3x56x224xf32> to vector<3x56x224xf32>
    %2 = vector.shape_cast %1 : vector<3x56x224xf32> to vector<3x56x4x56xf32>
    %3 = tpu.transpose %2, [2, 0, 1, 3] : vector<3x56x4x56xf32> -> vector<4x3x56x56xf32>
    %4 = vector.shape_cast %3 : vector<4x3x56x56xf32> to vector<1x4x3x56x56xf32>
    %c0_3 = arith.constant 0 : index
    %c0_4 = arith.constant 0 : index
    %c0_5 = arith.constant 0 : index
    %c0_6 = arith.constant 0 : index
    %c0_7 = arith.constant 0 : index
    %5 = vector.load %arg3[%c0_3, %c0_4, %c0_5, %c0_6, %c0_7] : memref<1x4x3x56x56xf32, #tpu.memory_space<vmem>>, vector<1x4x3x56x56xf32>
    tpu.vector_store %arg3[%c0_3, %c0_4, %c0_5, %c0_6, %c0_7], %4 {strides = array<i32>} : memref<1x4x3x56x56xf32, #tpu.memory_space<vmem>>, vector<1x4x3x56x56xf32>,
    return
  }
  func.func @transform_0(%arg0: i32, %arg1: i32) -> (i32, i32, i32, i32) {
    %c0_i32 = arith.constant 0 : i32
    %c0_i32_0 = arith.constant 0 : i32
    %c0_i32_1 = arith.constant 0 : i32
    return %arg0, %c0_i32, %arg1, %c0_i32_0 : i32, i32, i32, i32
  }
  func.func @transform_1(%arg0: i32, %arg1: i32) -> (i32, i32, i32, i32, i32) {
    %c0_i32 = arith.constant 0 : i32
    %c0_i32_0 = arith.constant 0 : i32
    %c0_i32_1 = arith.constant 0 : i32
    %c0_i32_2 = arith.constant 0 : i32
    return %arg0, %arg1, %c0_i32, %c0_i32_0, %c0_i32_1 : i32, i32, i32, i32, i32
  }
}

</mosaic_0001>

<bundles_post_ra>
// kernel: tpu_custom_call.1
= control target key start
LH: loop header
LB: loop body
LE: loop exit
PB: predicated region body
PF: predicated region fallthrough
CT: control target
= control target key end

     0   :  { %6 = vsyncpa [#allocation3], 0  ;;  %s5297_s0 = inlined_call_operand.hbm [shape: f32[2,3,224,224], index: 0, kind: input, shape index: {}]   ;;  %s5298_s1 = inlined_call_operand.hbm [shape: f32[2,16,3,56,56], index: 1, kind: output, shape index: {}]  }
   0x1   :  { %8 = vsyncpa [#allocation3 + $0x1], 0 }
   0x2   :  { %9 = vsyncpa [#allocation4], 0 }
   0x3   :  { %11 = vsyncpa [#allocation4 + $0x1], 0  ;;  %s3263_s6 = smov 0   ;;  %s3265_s7 = smov 0  }
   0x4   :  { %s3267_s8 = smov 0   ;;  %s3269_s9 = smov 0  }
   0x5   :  { %s3271_s10 = smov 0   ;;  %s3273_s11 = smov 0  }
   0x6   :  { %s3275_s12 = smov 0   ;;  %s3277_s13 = smov 0  }
   0x7 LB: > { %5335 = sst [smem:[#allocation11_spill]] %s3234_s12  ;;  %s3025_s14 = sadd.s32 4294967295, %s3238_s13   ;;  %s3238_s13 = sphi %s3277_s13, %s17_s13   ;;  %s3234_s12 = sphi %s3275_s12, %s5469_s12   ;;  %s3230_s11 = sphi %s3273_s11, %s5474_s11   ;;  %s3226_s10 = sphi %s3271_s10, %s5467_s10   ;;  %s3222_s9 = sphi %s3269_s9, %s5473_s9   ;;  %s3218_s8 = sphi %s3267_s8, %s5472_s8   ;;  %s3214_s7 = sphi %s3265_s7, %s5471_s7   ;;  %s3210_s6 = sphi %s3263_s6, %s5470_s6  }
   0x8   : > { %s3026_s15 = sadd.s32 4294967294, %s3238_s13   ;;  %s26_s16 = sadd.s32 1, %s3230_s11 }
   0x9   : > { %p27_p0 = scmp.ge.s32.totalorder %s26_s16, 4  ;;  %s29_s17 = sadd.s32 1, %s3234_s12 }
   0xa   : > { %p45_p1 = scmp.ne.s32.totalorder %s3218_s8, %s3214_s7  ;;  %p46_p2 = scmp.eq.s32.totalorder %s3238_s13, 0 }
   0xb   : > { %s5476_s16 = smov (%p27_p0, %s26_s16), 0  ;;  %s5478_s17 = smov (!%p27_p0, %s29_s17), %s3234_s12 }
   0xc   : > { %5336 = sst [smem:[#allocation12_spill]] %s5476_s16  ;;  %s34_s18 = ssub.s32 %s3230_s11, %s5476_s16 }
   0xd   : > { %p3315_p3 = por %p46_p2, %p45_p1  ;;  %p31_p4 = scmp.ge.s32.totalorder %s5478_s17, 2 }
   0xe   : > { %p51_p5 = scmp.ne.s32.totalorder %s3214_s7, %s3210_s6  ;;  %p52_p6 = scmp.eq.s32.totalorder %s3025_s14, 0 }
   0xf   : > { %p77_p7 = scmp.eq.s32.totalorder %s3025_s14, 7  ;;  %s5480_s17 = smov (%p31_p4, %s5478_s17), 0 }
  0x10   : > { %5338 = sst [smem:[#allocation13_spill]] %s5480_s17  ;;  %p3323_p8 = por %p52_p6, %p51_p5 }
  0x11   : > { %p3327_p9 = por %p77_p7, %p45_p1  ;;  %s33_s22 = ssub.s32 %s3234_s12, %s5480_s17 }
  0x12   : > { %p83_p10 = scmp.eq.s32.totalorder %s3026_s15, 7  ;;  %s35_s23 = sor.u32 %s34_s18, %s33_s22 }
  0x13   : > { %s38_s24 = sadd.s32 1, %s3218_s8  ;;  %p36_p11 = scmp.eq.s32.totalorder %s35_s23, 0 }
  0x14   : > { %p3334_p12 = por %p83_p10, %p51_p5  ;;  %p3028_p13 = scmp.ge.s32.totalorder %s3238_s13, 8 }
  0x15   : > { %s3339_s26 = scalar_select %p36_p11, %s3218_s8, %s38_s24  }
  0x16   : > { %99 = sbr.rel (%p3028_p13) target bundleno = 44 (0x2c), region = 16 }
  0x1b   : > { %s103_s27 = sand.u32 1, %s3218_s8   ;;  %s3039_s28 = smul.u32 14, %s3230_s11 }
  0x1c   : > { %s3040_s29 = smul.u32 336, %s103_s27  ;;  %s3240_s2 = smov 7168  }
  0x1d   : > { %s3041_s30 = smul.u32 168, %s3234_s12  ;;  %3047 = sst [smem:[#allocation7]] (%p3315_p3), %s3240_s2 }
  0x1e   : > { %s3046_s18 = scalar_select %p3315_p3, [#allocation0], [#allocation8] }
  0x1f   : > { %s113_s3 = sadd.s32 %s3041_s30, %s3039_s28  ;;  %s107_s22 = scalar_lea.vmem [#allocation2], %s3040_s29 }
  0x20   : > { %s3030_s4 = sshll.u32 %s113_s3, 3  ;;  %s130_s23 = sshll.u32 %s107_s22, 4  ;;  %s131_s23 = int_to_ptr.vmem [resolvable:$true] %s130_s23 }
  0x21   : > { %s115_s15 = scalar_lea.hbm %s5297_s0, %s3030_s4  ;;  %s3241_s24 = smov 1792  }
  0x22   : > { %3048 = sst [smem:[#allocation7 + $0x1]] (%p3315_p3), %s3241_s24  ;;  %s128_s16 = sshll.u32 %s115_s15, 4  ;;  %s129_s16 = int_to_ptr.hbm [resolvable:$true] %s128_s16 }
  0x23   : > { %s120_s17 = sld [smem:[%s3046_s18]]   ;;  %s3242_s12 = smov 7  }
  0x24   : > { %3049 = sst [smem:[#allocation7 + $0x2]] (%p3315_p3), %s3242_s12  ;;  %s3243_s28 = smov 256  }
  0x25   : > { %3050 = sst [smem:[#allocation7 + $0x3]] (%p3315_p3), %s3243_s28  ;;  %s3244_s30 = smov 16  }
  0x26   : > { %3051 = sst [smem:[#allocation7 + $0x4]] (%p3315_p3), %s3243_s28  ;;  %s104_s3 = scalar_lea.sflag [#allocation3], %s103_s27 }
  0x27   : > { %3052 = sst [smem:[#allocation7 + $0x5]] (%p3315_p3), %s3244_s30  ;;  %s3245_s4 = smov [#allocation6]  }
  0x29   : > { %s3031_s29 = sshll.u32 %s120_s17, 26 }
  0x2a   : > { %s3032_s2 = sadd.s32 134217728, %s3031_s29 }
  0x2b   : > { %3053 = dma.general (%p3315_p3), %s129_s16, 5376, %s131_s23, %s104_s3, %s3245_s4, [#allocation7], %s3032_s2, 0  }
  0x2c PF: > { %p3033_p0 = scmp.ge.s32.totalorder %s3238_s13, 1  ;;  %p151_p1 = scmp.lt.s32.totalorder %s3238_s13, 9 }
  0x2e   : > { %p152_p2 = pnand %p3033_p0, %p151_p1 }
  0x30   : > { %155 = sbr.rel (%p152_p2) target bundleno = 634 (0x27a), region = 24 }
  0x35   : > { %s3367_s12 = sand.u32 1, %s3214_s7  }
  0x36   : > { %s3042_s5 = smul.u32 336, %s3367_s12  ;;  %s158_s17 = scalar_lea.sflag [#allocation3], %s3367_s12 }
  0x38   : > { %s3371_s14 = scalar_lea.vmem [#allocation2], %s3042_s5 }
  0x39   : > { %3201 = dma.done.wait (%p3323_p8), %s158_s17, 5376  }
  0x3a   : > { %3203 = vsyncadd (%p3323_p8), %s158_s17, 4294961920  ;;  %v3378_v0 = vld [vmem:[%s3371_s14 + $0x40] sm:$0xff]  ;;  %s3246_s16 = smov 72   ;;  %v3393_v3 = vld [vmem:[%s3371_s14 + $0x50] sm:$0xff]  ;;  %s3247_s19 = smov 16   ;;  %vm414_vm0 = vcmask 130048  }
  0x3b   : > { %v3381_v1 = vld [vmem:[%s3371_s14 + $0x20] sm:$0xff]  ;;  %254 = vrot.lane.b32.xlu2 %v3378_v0, %s3246_s16  ;;  %v3396_v4 = vld [vmem:[%s3371_s14 + $0x30] sm:$0xff]  ;;  %v3483_v21 = vld [vmem:[%s3371_s14 + $0x8] sm:$0xff]  ;;  %s3248_s20 = smov 88   ;;  %vm521_vm1 = vcmask 1047556   ;;  %vm2831_vm2 = vcmask 457728  }
  0x3c   : > { %v3384_v2 = vld [vmem:[%s3371_s14] sm:$0xff]  ;;  %250 = vrot.lane.b32.xlu1 %v3381_v1, %s3246_s16  ;;  %v3399_v5 = vld [vmem:[%s3371_s14 + $0x10] sm:$0xff]  ;;  %v3492_v22 = vld [vmem:[%s3371_s14 + $0x28] sm:$0xff]  ;;  %s3043_s27 = smul.u32 672, %s3367_s12  ;;  %s2917_s2 = scalar_lea.sflag [#allocation4], %s3367_s12 }
  0x3d   : > { %246 = vrot.lane.b32.xlu0 %v3384_v2, %s3246_s16  ;;  %v3408_v6 = vld [vmem:[%s3371_s14 + $0x80] sm:$0xff]  ;;  %v3411_v7 = vld [vmem:[%s3371_s14 + $0x70] sm:$0xff]  ;;  %v3495_v23 = vld [vmem:[%s3371_s14 + $0x18] sm:$0xff]  ;;  %s3044_s18 = smul.u32 84, %s3222_s9 }
  0x3e   : > { %v3414_v8 = vld [vmem:[%s3371_s14 + $0x60] sm:$0xff]  ;;  %v3423_v9 = vld [vmem:[%s3371_s14 + $0xb0] sm:$0xff]  ;;  %v3504_v24 = vld [vmem:[%s3371_s14 + $0x38] sm:$0xff]  ;;  %s4131_s15 = scalar_lea.vmem [#allocation5], %s3043_s27  ;;  %s3045_s22 = smul.u32 336, %s3226_s10 }
  0x3f   : > { %v3426_v10 = vld [vmem:[%s3371_s14 + $0xa0] sm:$0xff]  ;;  %v3429_v11 = vld [vmem:[%s3371_s14 + $0x90] sm:$0xff]  ;;  %v3513_v25 = vld [vmem:[%s3371_s14 + $0x58] sm:$0xff]  ;;  %s2932_s30 = sshll.u32 %s4131_s15, 4  ;;  %s2933_s30 = int_to_ptr.vmem [resolvable:$true] %s2932_s30 }
  0x40   : > { %5342 = vst [vmem:[#allocation14_spill] sm:$0xff] %v3426_v10  ;;  %v3438_v12 = vld [vmem:[%s3371_s14 + $0xe0] sm:$0xff]  ;;  %v3441_v13 = vld [vmem:[%s3371_s14 + $0xd0] sm:$0xff]  ;;  %v3516_v26 = vld [vmem:[%s3371_s14 + $0x48] sm:$0xff]  ;;  %s2929_s9 = sadd.s32 %s3045_s22, %s3044_s18 }
  0x41   : > { %v3444_v14 = vld [vmem:[%s3371_s14 + $0xc0] sm:$0xff]  ;;  %v3453_v15 = vld [vmem:[%s3371_s14 + $0x110] sm:$0xff]  ;;  %v3525_v27 = vld [vmem:[%s3371_s14 + $0x68] sm:$0xff]  ;;  %s3036_s10 = sshll.u32 %s2929_s9, 3 }
  0x42   : > { %v3456_v16 = vld [vmem:[%s3371_s14 + $0x100] sm:$0xff]  ;;  %v3459_v17 = vld [vmem:[%s3371_s14 + $0xf0] sm:$0xff]  ;;  %v3536_v29 = vld [vmem:[%s3371_s14 + $0x88] sm:$0xff]  ;;  %s2931_s28 = scalar_lea.hbm %s5298_s1, %s3036_s10 }
  0x43   : > { %256 = vrot.lane.b32.xlu2 %v3393_v3, %s3246_s16  ;;  %v3468_v18 = vld [vmem:[%s3371_s14 + $0x140] sm:$0xff]  ;;  %v3471_v19 = vld [vmem:[%s3371_s14 + $0x130] sm:$0xff]  ;;  %v3539_v30 = vld [vmem:[%s3371_s14 + $0x78] sm:$0xff]  ;;  %s2934_s29 = sshll.u32 %s2931_s28, 4  ;;  %s2935_s29 = int_to_ptr.hbm [resolvable:$true] %s2934_s29 }
  0x44   : > { %252 = vrot.lane.b32.xlu1 %v3396_v4, %s3246_s16  ;;  %v3474_v20 = vld [vmem:[%s3371_s14 + $0x120] sm:$0xff]  ;;  %v3550_v32 = vld [vmem:[%s3371_s14 + $0x98] sm:$0xff]  ;;  %v3564_v35 = vld [vmem:[%s3371_s14 + $0xa8] sm:$0xff]  ;;  %s3154_s3 = sshra.s32 %s2935_s29, 4  ;;  %s3155_s3 = int_to_ptr.hbm [resolvable:$true] %s3154_s3 }
  0x45   : > { %248 = vrot.lane.b32.xlu0 %v3399_v5, %s3246_s16  ;;  %v3561_v34 = vld [vmem:[%s3371_s14 + $0xb8] sm:$0xff]  ;;  %v3579_v39 = vld [vmem:[%s3371_s14 + $0xc8] sm:$0xff]  ;;  %s3156_s4 = scalar_lea.hbm %s3155_s3, 672  ;;  %p3161_p6 = scmp.lt.s32.totalorder %s3155_s3, %s5298_s1 }
  0x46   : > { %v3594_v43 = vld [vmem:[%s3371_s14 + $0xe8] sm:$0xff]  ;;  %v3597_v44 = vld [vmem:[%s3371_s14 + $0xd8] sm:$0xff]  ;;  %p3157_p3 = scmp.ne.s32.totalorder %s3155_s3, %s3156_s4 }
  0x47   : > { %v3612_v48 = vld [vmem:[%s3371_s14 + $0xf8] sm:$0xff]  ;;  %v216_v53 = vld [vmem:[%s3371_s14 + $0x108] sm:$0xff] }
  0x48   : > { %v218_v52 = vld [vmem:[%s3371_s14 + $0x118] sm:$0xff]  ;;  %v3637_v57 = vld [vmem:[%s3371_s14 + $0x128] sm:$0xff]  ;;  %p3158_p4 = pnand %p3157_p3, %p3327_p9 }
  0x49   : > { %v224_v61 = vld [vmem:[%s3371_s14 + $0x148] sm:$0xff]  ;;  %v222_v62 = vld [vmem:[%s3371_s14 + $0x138] sm:$0xff] }
  0x4a   : > { %p3159_p5 = pneg %p3158_p4 }
  0x4b   : > { %262 = vrot.lane.b32.xlu2 %v3408_v6, %s3246_s16 }
  0x4c   : > { %260 = vrot.lane.b32.xlu1 %v3411_v7, %s3246_s16 }
  0x4d   : > { %258 = vrot.lane.b32.xlu0 %v3414_v8, %s3246_s16 }
  0x53   : > { %268 = vrot.lane.b32.xlu2 %v3423_v9, %s3246_s16 }
  0x54   : > { %266 = vrot.lane.b32.xlu1 %v3426_v10, %s3246_s16 }
  0x55   : > { %264 = vrot.lane.b32.xlu0 %v3429_v11, %s3246_s16 }
  0x5b   : > { %274 = vrot.lane.b32.xlu2 %v3438_v12, %s3246_s16 }
  0x5c   : > { %272 = vrot.lane.b32.xlu1 %v3441_v13, %s3246_s16 }
  0x5d   : > { %270 = vrot.lane.b32.xlu0 %v3444_v14, %s3246_s16 }
  0x63   : > { %280 = vrot.lane.b32.xlu2 %v3453_v15, %s3246_s16 }
  0x64   : > { %278 = vrot.lane.b32.xlu1 %v3456_v16, %s3246_s16 }
  0x65   : > { %276 = vrot.lane.b32.xlu0 %v3459_v17, %s3246_s16 }
  0x6b   : > { %286 = vrot.lane.b32.xlu2 %v3468_v18, %s3246_s16 }
  0x6c   : > { %284 = vrot.lane.b32.xlu1 %v3471_v19, %s3246_s16 }
  0x6d   : > { %282 = vrot.lane.b32.xlu0 %v3474_v20, %s3246_s16 }
  0x73   : > { %334 = vrot.lane.b32.xlu2 %v3399_v5, %s3247_s19 }
  0x74   : > { %332 = vrot.lane.b32.xlu1 %v3483_v21, %s3247_s19 }
  0x75   : > { %330 = vrot.lane.b32.xlu0 %v3384_v2, %s3247_s19 }
  0x7b   : > { %340 = vrot.lane.b32.xlu2 %v3492_v22, %s3247_s19 }
  0x7c   : > { %338 = vrot.lane.b32.xlu1 %v3381_v1, %s3247_s19 }
  0x7d   : > { %336 = vrot.lane.b32.xlu0 %v3495_v23, %s3247_s19 }
  0x83   : > { %346 = vrot.lane.b32.xlu2 %v3378_v0, %s3247_s19 }
  0x84   : > { %344 = vrot.lane.b32.xlu1 %v3504_v24, %s3247_s19 }
  0x85   : > { %342 = vrot.lane.b32.xlu0 %v3396_v4, %s3247_s19 }
  0x8b   : > { %352 = vrot.lane.b32.xlu2 %v3513_v25, %s3247_s19 }
  0x8c   : > { %350 = vrot.lane.b32.xlu1 %v3393_v3, %s3247_s19 }
  0x8d   : > { %348 = vrot.lane.b32.xlu0 %v3516_v26, %s3247_s19 }
  0x93   : > { %358 = vrot.lane.b32.xlu2 %v3411_v7, %s3247_s19 }
  0x94   : > { %356 = vrot.lane.b32.xlu1 %v3525_v27, %s3247_s19 }
  0x95   : > { %354 = vrot.lane.b32.xlu0 %v3414_v8, %s3247_s19  ;;  %v3533_v28 = vpop.permute.xlu2 %254 }
  0x9b   : > { %364 = vrot.lane.b32.xlu2 %v3536_v29, %s3247_s19 }
  0x9c   : > { %362 = vrot.lane.b32.xlu1 %v3408_v6, %s3247_s19 }
  0x9d   : > { %360 = vrot.lane.b32.xlu0 %v3539_v30, %s3247_s19  ;;  %v3547_v31 = vpop.permute.xlu2 %256 }
  0xa3   : > { %370 = vrot.lane.b32.xlu2 %v3426_v10, %s3247_s19 }
  0xa4   : > { %368 = vrot.lane.b32.xlu1 %v3550_v32, %s3247_s19 }
  0xa5   : > { %366 = vrot.lane.b32.xlu0 %v3429_v11, %s3247_s19  ;;  %v3558_v33 = vpop.permute.xlu2 %262 }
  0xab   : > { %376 = vrot.lane.b32.xlu2 %v3561_v34, %s3247_s19 }
  0xac   : > { %374 = vrot.lane.b32.xlu1 %v3423_v9, %s3247_s19 }
  0xad   : > { %372 = vrot.lane.b32.xlu0 %v3564_v35, %s3247_s19  ;;  %v3572_v36 = vpop.permute.xlu2 %268 }
  0xae   : > { %v3574_v37 = vpop.permute.xlu1 %250 }
  0xaf   : > { %v3576_v38 = vpop.permute.xlu0 %246 }
  0xb3   : > { %382 = vrot.lane.b32.xlu2 %v3441_v13, %s3247_s19 }
  0xb4   : > { %380 = vrot.lane.b32.xlu1 %v3579_v39, %s3247_s19 }
  0xb5   : > { %378 = vrot.lane.b32.xlu0 %v3444_v14, %s3247_s19  ;;  %v3587_v40 = vpop.permute.xlu2 %274 }
  0xb6   : > { %v3589_v41 = vpop.permute.xlu1 %252 }
  0xb7   : > { %5343 = vst [vmem:[#allocation15_spill] sm:$0xff] %v3589_v41  ;;  %v3591_v42 = vpop.permute.xlu0 %248 }
  0xbb   : > { %388 = vrot.lane.b32.xlu2 %v3594_v43, %s3247_s19 }
  0xbc   : > { %386 = vrot.lane.b32.xlu1 %v3438_v12, %s3247_s19 }
  0xbd   : > { %384 = vrot.lane.b32.xlu0 %v3597_v44, %s3247_s19  ;;  %v3605_v45 = vpop.permute.xlu2 %280 }
  0xbe   : > { %5344 = vst [vmem:[#allocation16_spill] sm:$0xff] %v3605_v45  ;;  %v3607_v46 = vpop.permute.xlu1 %260 }
  0xbf   : > { %5345 = vst [vmem:[#allocation17_spill] sm:$0xff] %v3607_v46  ;;  %v3609_v47 = vpop.permute.xlu0 %258 }
  0xc0   : > { %5346 = vst [vmem:[#allocation18_spill] sm:$0xff] %v3609_v47 }
  0xc3   : > { %394 = vrot.lane.b32.xlu2 %v3456_v16, %s3247_s19 }
  0xc4   : > { %392 = vrot.lane.b32.xlu1 %v3612_v48, %s3247_s19 }
  0xc5   : > { %390 = vrot.lane.b32.xlu0 %v3459_v17, %s3247_s19  ;;  %v3620_v49 = vpop.permute.xlu2 %286 }
  0xc6   : > { %5347 = vst [vmem:[#allocation19_spill] sm:$0xff] %v3620_v49  ;;  %v3622_v50 = vpop.permute.xlu1 %266 }
  0xc7   : > { %5348 = vst [vmem:[#allocation20_spill] sm:$0xff] %v3622_v50  ;;  %v3624_v51 = vpop.permute.xlu0 %264 }
  0xc8   : > { %5349 = vst [vmem:[#allocation21_spill] sm:$0xff] %v3624_v51 }
  0xcb   : > { %400 = vrot.lane.b32.xlu2 %v218_v52, %s3247_s19 }
  0xcc   : > { %398 = vrot.lane.b32.xlu1 %v3453_v15, %s3247_s19 }
  0xcd   : > { %396 = vrot.lane.b32.xlu0 %v216_v53, %s3247_s19  ;;  %v335_v55 = vpop.permute.xlu2 %334 }
  0xce   : > { %v3632_v54 = vpop.permute.xlu1 %272 }
  0xcf   : > { %5350 = vst [vmem:[#allocation22_spill] sm:$0xff] %v3632_v54  ;;  %v3634_v56 = vpop.permute.xlu0 %270 }
  0xd0   : > { %5351 = vst [vmem:[#allocation23_spill] sm:$0xff] %v3634_v56 }
  0xd3   : > { %406 = vrot.lane.b32.xlu2 %v3471_v19, %s3247_s19 }
  0xd4   : > { %404 = vrot.lane.b32.xlu1 %v3637_v57, %s3247_s19 }
  0xd5   : > { %402 = vrot.lane.b32.xlu0 %v3474_v20, %s3247_s19  ;;  %v3647_v59 = vpop.permute.xlu2 %340 }
  0xd6   : > { %v3645_v58 = vpop.permute.xlu1 %278 }
  0xd7   : > { %5352 = vst [vmem:[#allocation24_spill] sm:$0xff] %v3645_v58  ;;  %v3649_v60 = vpop.permute.xlu0 %276 }
  0xd8   : > { %5353 = vst [vmem:[#allocation25_spill] sm:$0xff] %v3649_v60 }
  0xdb   : > { %412 = vrot.lane.b32.xlu2 %v224_v61, %s3247_s19 }
  0xdc   : > { %410 = vrot.lane.b32.xlu1 %v3468_v18, %s3247_s19 }
  0xdd   : > { %408 = vrot.lane.b32.xlu0 %v222_v62, %s3247_s19  ;;  %v347_v56 = vpop.permute.xlu2 %346 }
  0xde   : > { %v3657_v63 = vpop.permute.xlu1 %284 }
  0xdf   : > { %5354 = vst [vmem:[#allocation26_spill] sm:$0xff] %v3657_v63  ;;  %v3659_v54 = vpop.permute.xlu0 %282 }
  0xe0   : > { %5355 = vst [vmem:[#allocation27_spill] sm:$0xff] %v3659_v54 }
  0xe3   : > { %461 = vrot.lane.b32.xlu2 %v3492_v22, %s3248_s20 }
  0xe4   : > { %459 = vrot.lane.b32.xlu1 %v3495_v23, %s3248_s20 }
  0xe5   : > { %457 = vrot.lane.b32.xlu0 %v3483_v21, %s3248_s20  ;;  %v3667_v60 = vpop.permute.xlu2 %352 }
  0xe6   : > { %v333_v58 = vpop.permute.xlu1 %332 }
  0xe7   : > { %v331_v51 = vpop.permute.xlu0 %330 }
  0xe8   : > { %v3670_v63 = vsel %vm414_vm0, %v331_v51, %v333_v58 }
  0xeb   : > { %467 = vrot.lane.b32.xlu2 %v3513_v25, %s3248_s20 }
  0xec   : > { %465 = vrot.lane.b32.xlu1 %v3516_v26, %s3248_s20 }
  0xed   : > { %463 = vrot.lane.b32.xlu0 %v3504_v24, %s3248_s20  ;;  %v359_v22 = vpop.permute.xlu2 %358 }
  0xee   : > { %v3678_v23 = vpop.permute.xlu1 %338 }
  0xef   : > { %v337_v21 = vpop.permute.xlu0 %336  ;;  %v417_v10 = vsel %vm414_vm0, %v3678_v23, %v3647_v59 }
  0xf0   : > { %v3681_v54 = vsel %vm414_vm0, %v335_v55, %v337_v21 }
  0xf1   : > { %v577_v45 = vrot.slane %v3681_v54, 4 }
  0xf3   : > { %473 = vrot.lane.b32.xlu2 %v3536_v29, %s3248_s20 }
  0xf4   : > { %471 = vrot.lane.b32.xlu1 %v3539_v30, %s3248_s20 }
  0xf5   : > { %469 = vrot.lane.b32.xlu0 %v3525_v27, %s3248_s20  ;;  %v3689_v25 = vpop.permute.xlu2 %364 }
  0xf6   : > { %v345_v26 = vpop.permute.xlu1 %344 }
  0xf7   : > { %v343_v24 = vpop.permute.xlu0 %342 }
  0xf8   : > { %v3692_v51 = vsel %vm414_vm0, %v343_v24, %v345_v26 }
  0xfb   : > { %479 = vrot.lane.b32.xlu2 %v3561_v34, %s3248_s20 }
  0xfc   : > { %477 = vrot.lane.b32.xlu1 %v3564_v35, %s3248_s20 }
  0xfd   : > { %475 = vrot.lane.b32.xlu0 %v3550_v32, %s3248_s20  ;;  %v3700_v29 = vpop.permute.xlu2 %370 }
  0xfe   : > { %v3702_v30 = vpop.permute.xlu1 %350 }
  0xff   : > { %v349_v27 = vpop.permute.xlu0 %348 }
 0x100   : > { %v3705_v55 = vsel %vm414_vm0, %v347_v56, %v349_v27  ;;  %v5374_v27 = vrot.slane %v3423_v9, 4 }
 0x103   : > { %485 = vrot.lane.b32.xlu2 %v3594_v43, %s3248_s20 }
 0x104   : > { %483 = vrot.lane.b32.xlu1 %v3597_v44, %s3248_s20 }
 0x105   : > { %481 = vrot.lane.b32.xlu0 %v3579_v39, %s3248_s20  ;;  %v3713_v34 = vpop.permute.xlu2 %376 }
 0x106   : > { %v357_v32 = vpop.permute.xlu1 %356 }
 0x107   : > { %v355_v35 = vpop.permute.xlu0 %354 }
 0x108   : > { %v3716_v58 = vsel %vm414_vm0, %v355_v35, %v357_v32  ;;  %v520_v32 = vrot.slane %v3670_v63, 4 }
 0x10a   : > { %v522_v50 = vsel %vm521_vm1, %v520_v32, %v3384_v2 }
 0x10b   : > { %491 = vrot.lane.b32.xlu2 %v218_v52, %s3248_s20  ;;  %v635_v52 = vrot.slane %v3381_v1, 4 }
 0x10c   : > { %489 = vrot.lane.b32.xlu1 %v216_v53, %s3248_s20  ;;  %v523_v53 = vrot.slane %v3384_v2, 4 }
 0x10d   : > { %487 = vrot.lane.b32.xlu0 %v3612_v48, %s3248_s20  ;;  %v3722_v43 = vpop.permute.xlu2 %382  ;;  %v689_v48 = vrot.slane %v3692_v51, 4 }
 0x10e   : > { %5356 = vst [vmem:[#allocation28_spill] sm:$0xff] %v3722_v43  ;;  %v3724_v44 = vpop.permute.xlu1 %362 }
 0x10f   : > { %v361_v56 = vpop.permute.xlu0 %360 }
 0x110   : > { %v3727_v39 = vsel %vm414_vm0, %v359_v22, %v361_v56  ;;  %v579_v22 = vrot.slane %v3399_v5, 4 }
 0x112   : > { %v580_v47 = vsel %vm521_vm1, %v3681_v54, %v579_v22  ;;  %v690_v54 = vsel %vm521_vm1, %v689_v48, %v3396_v4  ;;  %v857_v48 = vrot.slane %v3716_v58, 4 }
 0x113   : > { %497 = vrot.lane.b32.xlu2 %v224_v61, %s3248_s20 }
 0x114   : > { %495 = vrot.lane.b32.xlu1 %v222_v62, %s3248_s20 }
 0x115   : > { %493 = vrot.lane.b32.xlu0 %v3637_v57, %s3248_s20  ;;  %v3740_v61 = vpop.permute.xlu2 %388  ;;  %v633_v57 = vrot.slane %v417_v10, 4 }
 0x116   : > { %5357 = vst [vmem:[#allocation29_spill] sm:$0xff] %v3740_v61  ;;  %v369_v62 = vpop.permute.xlu1 %368  ;;  %v3249_v61 = vmov 1983009808  }
 0x117   : > { %v367_v21 = vpop.permute.xlu0 %366  ;;  %v526_v35 = vunpack.c.l.s4 %v3249_v61  ;;  %v524_v61 = vsel %vm521_vm1, %v3670_v63, %v523_v53  ;;  %v634_v49 = vsel %vm521_vm1, %v633_v57, %v3381_v1 }
 0x118   : > { %v3750_v24 = vsel %vm414_vm0, %v367_v21, %v369_v62 }
 0x119   : > { %v3771_v21 = vunpack.c.0.s8 %v526_v35  ;;  %v420_v35 = vsel %vm414_vm0, %v3702_v30, %v3667_v60  ;;  %v578_v60 = vsel %vm521_vm1, %v577_v45, %v3399_v5  ;;  %v5365_v30 = vrot.slane %v3396_v4, 4 }
 0x11a   : > { %v801_v32 = vrot.slane %v420_v35, 4 }
 0x11b   : > { %v3794_v23 = vperm.slane %v524_v61, %v3771_v21  ;;  %v692_v2 = vsel %vm521_vm1, %v3692_v51, %v5365_v30  ;;  %v3828_v5 = vperm.slane %v634_v49, %v3771_v21  ;;  %v3831_v45 = vperm.slane %v580_v47, %v3771_v21 }
 0x11c   : > { %v5366_v51 = vrot.slane %v3393_v3, 4  ;;  %v3842_v30 = vperm.slane %v578_v60, %v3771_v21  ;;  %v3845_v4 = vperm.slane %v692_v2, %v3771_v21  ;;  %v5367_v47 = vrot.slane %v3378_v0, 4 }
 0x11d   : > { %v3778_v56 = vpop.permute.xlu2 %394  ;;  %v1025_v61 = vrot.slane %v3750_v24, 4 }
 0x11e   : > { %v3780_v59 = vpop.permute.xlu1 %374  ;;  %v804_v22 = vsel %vm521_vm1, %v420_v35, %v5366_v51  ;;  %v748_v49 = vsel %vm521_vm1, %v3705_v55, %v5367_v47  ;;  %v3853_v51 = vperm.slane %v690_v54, %v3771_v21 }
 0x11f   : > { %v373_v26 = vpop.permute.xlu0 %372  ;;  %v3868_v62 = vperm.slane %v748_v49, %v3771_v21 }
 0x120   : > { %v3790_v63 = vsel %vm414_vm0, %v3700_v29, %v373_v26  ;;  %v636_v29 = vsel %vm521_vm1, %v417_v10, %v635_v52  ;;  %v745_v10 = vrot.slane %v3705_v55, 4  ;;  %v3819_v52 = vperm.slane %v522_v50, %v3771_v21 }
 0x121   : > { %v3823_v1 = vperm.slane %v636_v29, %v3771_v21  ;;  %v423_v50 = vsel %vm414_vm0, %v3724_v44, %v3689_v25  ;;  %v802_v25 = vsel %vm521_vm1, %v801_v32, %v3393_v3  ;;  %v3863_v55 = vperm.slane %v804_v22, %v3771_v21 }
 0x122   : > { %v746_v44 = vsel %vm521_vm1, %v745_v10, %v3378_v0  ;;  %v969_v47 = vrot.slane %v423_v50, 4  ;;  %v5368_v3 = vrot.slane %v3414_v8, 4  ;;  %v3875_v32 = vperm.slane %v802_v25, %v3771_v21 }
 0x123   : > { %v3878_v10 = vperm.slane %v746_v44, %v3771_v21  ;;  %v858_v22 = vsel %vm521_vm1, %v857_v48, %v3414_v8  ;;  %v5370_v48 = vrot.slane %v3411_v7, 4  ;;  %v5377_v26 = vrot.slane %v3444_v14, 4 }
 0x124   : > { %v860_v0 = vsel %vm521_vm1, %v3716_v58, %v5368_v3  ;;  %v913_v58 = vrot.slane %v3727_v39, 4  ;;  %v970_v8 = vsel %vm521_vm1, %v969_v47, %v3408_v6  ;;  %v3900_v3 = vperm.slane %v858_v22, %v3771_v21  ;;  %v5371_v22 = vld [vmem:[#allocation29_spill] sm:$0xff] }
 0x125   : > { %v3839_v57 = vpop.permute.xlu2 %400  ;;  %v3891_v44 = vperm.slane %v860_v0, %v3771_v21  ;;  %v426_v0 = vsel %vm414_vm0, %v3780_v59, %v3713_v34  ;;  %v3917_v49 = vperm.slane %v970_v8, %v3771_v21  ;;  %v5372_v59 = vld [vmem:[#allocation28_spill] sm:$0xff]  ;;  %v1081_v8 = vrot.slane %v3790_v63, 4 }
 0x126   : > { %v381_v29 = vpop.permute.xlu1 %380  ;;  %v914_v25 = vsel %vm521_vm1, %v913_v58, %v3411_v7  ;;  %v1026_v58 = vsel %vm521_vm1, %v1025_v61, %v3429_v11  ;;  %v1140_v7 = vsel %vm521_vm1, %v426_v0, %v5374_v27  ;;  %v5375_v61 = vld [vmem:[#allocation14_spill] sm:$0xff] }
 0x127   : > { %v379_v35 = vpop.permute.xlu0 %378  ;;  %v3948_v53 = vperm.slane %v1026_v58, %v3771_v21  ;;  %v5376_v41 = vrot.slane %v5375_v61, 4 }
 0x128   : > { %v427_v60 = vsel %vm414_vm0, %v379_v35, %v381_v29  ;;  %v5369_v29 = vrot.slane %v3408_v6, 4 }
 0x129   : > { %v1196_v27 = vsel %vm521_vm1, %v427_v60, %v5377_v26 }
 0x12a   : > { %v972_v35 = vsel %vm521_vm1, %v423_v50, %v5369_v29  ;;  %v916_v50 = vsel %vm521_vm1, %v3727_v39, %v5370_v48  ;;  %v5373_v39 = vrot.slane %v3429_v11, 4 }
 0x12b   : > { %v3903_v29 = vperm.slane %v972_v35, %v3771_v21  ;;  %v3922_v34 = vperm.slane %v916_v50, %v3771_v21  ;;  %v1193_v50 = vrot.slane %v427_v60, 4 }
 0x12d   : > { %v3909_v2 = vpop.permute.xlu2 %406 }
 0x12e   : > { %v387_v6 = vpop.permute.xlu1 %386 }
 0x12f   : > { %v429_v48 = vsel %vm414_vm0, %v387_v6, %v5371_v22  ;;  %v385_v35 = vpop.permute.xlu0 %384  ;;  %v1028_v6 = vsel %vm521_vm1, %v3750_v24, %v5373_v39  ;;  %v1137_v22 = vrot.slane %v426_v0, 4  ;;  %v1084_v24 = vsel %vm521_vm1, %v3790_v63, %v5376_v41 }
 0x130   : > { %v428_v47 = vsel %vm414_vm0, %v5372_v59, %v385_v35  ;;  %v3937_v35 = vperm.slane %v914_v25, %v3771_v21  ;;  %v1305_v59 = vrot.slane %v429_v48, 4  ;;  %v3942_v39 = vperm.slane %v1028_v6, %v3771_v21 }
 0x131   : > { %v1249_v54 = vrot.slane %v428_v47, 4  ;;  %v1138_v11 = vsel %vm521_vm1, %v1137_v22, %v3423_v9  ;;  %v1082_v25 = vsel %vm521_vm1, %v1081_v8, %v5375_v61  ;;  %v1194_v6 = vsel %vm521_vm1, %v1193_v50, %v3444_v14 }
 0x132   : > { %v5378_v0 = vrot.slane %v3438_v12, 4  ;;  %v3250_v8 = vmov 1934713408   ;;  %v3969_v61 = vperm.slane %v1140_v7, %v3771_v21  ;;  %v1306_v41 = vsel %vm521_vm1, %v1305_v59, %v3438_v12 }
 0x133   : > { %v550_v46 = vunpack.c.l.s4 %v3250_v8  ;;  %v1250_v14 = vsel %vm521_vm1, %v1249_v54, %v3441_v13  ;;  %v5379_v63 = vrot.slane %v3441_v13, 4  ;;  %v3982_v50 = vperm.slane %v1082_v25, %v3771_v21 }
 0x134   : > { %v1308_v58 = vsel %vm521_vm1, %v429_v48, %v5378_v0  ;;  %v3979_v48 = vperm.slane %v1138_v11, %v3771_v21  ;;  %v3985_v7 = vperm.slane %v1084_v24, %v3771_v21  ;;  %v3989_v12 = vperm.slane %v1194_v6, %v3771_v21 }
 0x135   : > { %v3966_v9 = vpop.permute.xlu2 %412  ;;  %v1252_v26 = vsel %vm521_vm1, %v428_v47, %v5379_v63  ;;  %v3992_v54 = vperm.slane %v1196_v27, %v3771_v21  ;;  %v3995_v13 = vperm.slane %v1308_v58, %v3771_v21  ;;  %v3998_v59 = vperm.slane %v1306_v41, %v3771_v21 }
 0x136   : > { %v393_v22 = vpop.permute.xlu1 %392  ;;  %5380 = vst [vmem:[#allocation29_spill] sm:$0xff] %v3989_v12  ;;  %v4001_v11 = vperm.slane %v1250_v14, %v3771_v21  ;;  %v4004_v24 = vperm.slane %v1252_v26, %v3771_v21  ;;  %v5383_v25 = vrot.slane %v3459_v17, 4  ;;  %v4012_v8 = vunpack.c.0.s8 %v550_v46 }
 0x137   : > { %v391_v60 = vpop.permute.xlu0 %390  ;;  %5381 = vst [vmem:[#allocation28_spill] sm:$0xff] %v3992_v54  ;;  %v5387_v27 = vrot.slane %v3453_v15, 4 }
 0x138   : > { %v430_v0 = vsel %vm414_vm0, %v391_v60, %v393_v22  ;;  %5382 = vst [vmem:[#allocation14_spill] sm:$0xff] %v4004_v24 }
 0x139   : > { %v1361_v47 = vrot.slane %v430_v0, 4  ;;  %v1364_v6 = vsel %vm521_vm1, %v430_v0, %v5383_v25  ;;  %v5386_v0 = vrot.slane %v3574_v37, 4 }
 0x13a   : > { %v4023_v22 = vperm.slane %v1364_v6, %v3771_v21 }
 0x13b   : > { %v1362_v26 = vsel %vm521_vm1, %v1361_v47, %v3459_v17 }
 0x13c   : > { %5384 = vst [vmem:[#allocation30_spill] sm:$0xff] %v4023_v22  ;;  %v4030_v17 = vperm.slane %v1362_v26, %v3771_v21 }
 0x13d   : > { %v462_v14 = vpop.permute.xlu2 %461 }
 0x13e   : > { %v399_v41 = vpop.permute.xlu1 %398  ;;  %5385 = vst [vmem:[#allocation31_spill] sm:$0xff] %v4030_v17  ;;  %v645_v47 = vrot.slane %v462_v14, 4  ;;  %v648_v25 = vsel %vm521_vm1, %v462_v14, %v5386_v0 }
 0x13f   : > { %v432_v6 = vsel %vm414_vm0, %v399_v41, %v3839_v57  ;;  %v397_v60 = vpop.permute.xlu0 %396  ;;  %v656_v46 = vperm.slane %v648_v25, %v3771_v21  ;;  %v5388_v25 = vrot.slane %v3823_v1, 4 }
 0x140   : > { %v1473_v58 = vrot.slane %v432_v6, 4  ;;  %v1476_v63 = vsel %vm521_vm1, %v432_v6, %v5387_v27  ;;  %v431_v26 = vsel %vm414_vm0, %v3778_v56, %v397_v60  ;;  %v646_v43 = vsel %vm521_vm1, %v645_v47, %v3574_v37 }
 0x141   : > { %v4047_v14 = vperm.slane %v1476_v63, %v3771_v21  ;;  %v1417_v57 = vrot.slane %v431_v26, 4  ;;  %v652_v41 = vperm.slane %v646_v43, %v3771_v21  ;;  %v669_v0 = vrot.slane %v656_v46, 4 }
 0x142   : > { %v672_v12 = vsel %vm521_vm1, %v656_v46, %v5388_v25  ;;  %v1474_v27 = vsel %vm521_vm1, %v1473_v58, %v3453_v15  ;;  %v5389_v63 = vrot.slane %v3456_v16, 4  ;;  %v5390_v6 = vrot.slane %v3828_v5, 4 }
 0x143   : > { %v680_v56 = vperm.slane %v672_v12, %v4012_v8  ;;  %v4057_v60 = vperm.slane %v1474_v27, %v3771_v21  ;;  %v1418_v37 = vsel %vm521_vm1, %v1417_v57, %v3456_v16  ;;  %v657_v47 = vrot.slane %v652_v41, 4 }
 0x144   : > { %v1420_v43 = vsel %vm521_vm1, %v431_v26, %v5389_v63  ;;  %v660_v46 = vsel %vm521_vm1, %v652_v41, %v5390_v6  ;;  %v670_v15 = vsel %vm521_vm1, %v669_v0, %v3823_v1  ;;  %v4070_v12 = vperm.slane %v1418_v37, %v3771_v21 }
 0x145   : > { %v668_v25 = vperm.slane %v660_v46, %v4012_v8  ;;  %v676_v57 = vperm.slane %v670_v15, %v4012_v8  ;;  %v687_v16 = vrot.slane %v680_v56, 4  ;;  %v658_v26 = vsel %vm521_vm1, %v657_v47, %v3828_v5  ;;  %v468_v1 = vpop.permute.xlu2 %467 }
 0x146   : > { %5391 = vst [vmem:[#allocation32_spill] sm:$0xff] %v4070_v12  ;;  %v4080_v63 = vperm.slane %v1420_v43, %v3771_v21  ;;  %v664_v0 = vperm.slane %v658_v26, %v4012_v8  ;;  %v813_v5 = vrot.slane %v468_v1, 4 }
 0x147   : > { %v683_v37 = vrot.slane %v668_v25, 4  ;;  %v685_v6 = vrot.slane %v676_v57, 4  ;;  %v688_v46 = vsel %vm521_vm1, 0.0, %v687_v16  ;;  %v1816_v15 = vsel %vm521_vm1, %v687_v16, %v676_v57  ;;  %v405_v16 = vpop.permute.xlu1 %404 }
 0x148   : > { %v1821_v56 = vrot.slane %v688_v46, 4  ;;  %v681_v47 = vrot.slane %v664_v0, 4  ;;  %v1820_v27 = vperm.slane %v1816_v15, %v3771_v21  ;;  %v403_v46 = vpop.permute.xlu0 %402  ;;  %v814_v17 = vsel %vm521_vm1, %v813_v5, %v3547_v31 }
 0x149   : > { %v684_v58 = vsel %vm521_vm1, 0.0, %v683_v37  ;;  %v686_v43 = vsel %vm521_vm1, 0.0, %v685_v6  ;;  %v1805_v41 = vsel %vm521_vm1, %v683_v37, %v664_v0  ;;  %v5392_v6 = vrot.slane %v3547_v31, 4 }
 0x14a   : > { %v1809_v25 = vperm.slane %v1805_v41, %v3771_v21  ;;  %v1810_v26 = vrot.slane %v684_v58, 4  ;;  %v1822_v57 = vsel %vm521_vm1, %v1821_v56, %v686_v43  ;;  %v682_v54 = vsel %vm521_vm1, 0.0, %v681_v47 }
 0x14b   : > { %v1826_v22 = vperm.slane %v1822_v57, %v3771_v21  ;;  %v816_v0 = vsel %vm521_vm1, %v468_v1, %v5392_v6  ;;  %v1841_v37 = vrot.slane %v1820_v27, 4  ;;  %v820_v15 = vperm.slane %v814_v17, %v3771_v21 }
 0x14c   : > { %v1811_v41 = vsel %vm521_vm1, %v1810_v26, %v682_v54  ;;  %v1829_v58 = vrot.slane %v1809_v25, 4  ;;  %v824_v47 = vperm.slane %v816_v0, %v3771_v21  ;;  %v433_v57 = vsel %vm414_vm0, %v403_v46, %v405_v16 }
 0x14d   : > { %v1815_v56 = vperm.slane %v1811_v41, %v3771_v21  ;;  %v1839_v43 = vrot.slane %v1826_v22, 4  ;;  %v1842_v5 = vsel %vm521_vm1, %v1826_v22, %v1841_v37  ;;  %v825_v12 = vrot.slane %v820_v15, 4 }
 0x14e   : > { %v5393_v31 = vrot.slane %v3875_v32, 4  ;;  %v1529_v54 = vrot.slane %v433_v57, 4  ;;  %v1850_v41 = vperm.slane %v1842_v5, %v4012_v8  ;;  %v5394_v5 = vrot.slane %v3863_v55, 4 }
 0x14f   : > { %v1827_v26 = vrot.slane %v1815_v56, 4  ;;  %v1830_v6 = vsel %vm521_vm1, %v1815_v56, %v1829_v58  ;;  %v1840_v17 = vsel %vm521_vm1, %v1839_v43, %v1820_v27  ;;  %v826_v22 = vsel %vm521_vm1, %v825_v12, %v3875_v32 }
 0x150   : > { %v828_v1 = vsel %vm521_vm1, %v820_v15, %v5393_v31  ;;  %v1838_v24 = vperm.slane %v1830_v6, %v4012_v8  ;;  %v1846_v0 = vperm.slane %v1840_v17, %v4012_v8  ;;  %v1855_v37 = vrot.slane %v1850_v41, 4 }
 0x151   : > { %v836_v16 = vperm.slane %v828_v1, %v4012_v8  ;;  %v1828_v46 = vsel %vm521_vm1, %v1827_v26, %v1809_v25  ;;  %v832_v15 = vperm.slane %v826_v22, %v4012_v8  ;;  %v837_v58 = vrot.slane %v824_v47, 4 }
 0x152   : > { %v1834_v27 = vperm.slane %v1828_v46, %v4012_v8  ;;  %v1851_v56 = vrot.slane %v1846_v0, 4  ;;  %v1857_v43 = vrot.slane %v1838_v24, 4  ;;  %v840_v31 = vsel %vm521_vm1, %v824_v47, %v5394_v5 }
 0x153   : > { %v1856_v6 = vsel %vm521_vm1, %v1855_v37, %v1838_v24  ;;  %v838_v32 = vsel %vm521_vm1, %v837_v58, %v3863_v55  ;;  %v848_v12 = vperm.slane %v840_v31, %v4012_v8  ;;  %v849_v25 = vrot.slane %v832_v15, 4 }
 0x154   : > { %v1852_v1 = vsel %vm521_vm1, %v1851_v56, %v1834_v27  ;;  %v1853_v26 = vrot.slane %v1834_v27, 4  ;;  %v1858_v17 = vsel %vm521_vm1, %v1850_v41, %v1857_v43  ;;  %2876 = vst.msk [vmem:[%s4131_s15 + $0x160] sm:$0xff] %vm2831_vm2, %v1856_v6  ;;  %v844_v24 = vperm.slane %v838_v32, %v4012_v8  ;;  %v474_v43 = vpop.permute.xlu2 %473 }
 0x155   : > { %2834 = vst.msk [vmem:[%s4131_s15 + $0x10] sm:$0xff] %vm2831_vm2, %v1852_v1  ;;  %v850_v55 = vsel %vm521_vm1, 0.0, %v849_v25  ;;  %v851_v47 = vrot.slane %v836_v16, 4  ;;  %v855_v22 = vrot.slane %v848_v12, 4  ;;  %v1530_v41 = vsel %vm521_vm1, %v1529_v54, %v3474_v20 }
 0x156   : > { %v1854_v46 = vsel %vm521_vm1, %v1846_v0, %v1853_v26  ;;  %2897 = vst.msk [vmem:[%s4131_s15 + $0x208] sm:$0xff] %vm2831_vm2, %v1858_v17  ;;  %v853_v37 = vrot.slane %v844_v24, 4  ;;  %v5395_v58 = vrot.slane %v3474_v20, 4  ;;  %v4148_v56 = vperm.slane %v1530_v41, %v3771_v21  ;;  %v411_v26 = vpop.permute.xlu1 %410 }
 0x157   : > { %2855 = vst.msk [vmem:[%s4131_s15 + $0xb8] sm:$0xff] %vm2831_vm2, %v1854_v46  ;;  %v852_v16 = vsel %vm521_vm1, 0.0, %v851_v47  ;;  %v856_v5 = vsel %vm521_vm1, 0.0, %v855_v22  ;;  %v1967_v54 = vsel %vm521_vm1, %v851_v47, %v832_v15  ;;  %v1978_v0 = vsel %vm521_vm1, %v855_v22, %v844_v24 }
 0x158   : > { %v1532_v27 = vsel %vm521_vm1, %v433_v57, %v5395_v58  ;;  %v854_v31 = vsel %vm521_vm1, 0.0, %v853_v37  ;;  %v1971_v20 = vperm.slane %v1967_v54, %v3771_v21  ;;  %v1972_v6 = vrot.slane %v852_v16, 4 }
 0x159   : > { %v1982_v57 = vperm.slane %v1978_v0, %v3771_v21  ;;  %v1455_v32 = vrot.slane %v4080_v63, 4  ;;  %v1983_v12 = vrot.slane %v856_v5, 4  ;;  %v4161_v25 = vperm.slane %v1532_v27, %v3771_v21 }
 0x15a   : > { %v981_v1 = vrot.slane %v474_v43, 4  ;;  %v1973_v17 = vsel %vm521_vm1, %v1972_v6, %v850_v55  ;;  %v1991_v15 = vrot.slane %v1971_v20, 4  ;;  %v5396_v24 = vrot.slane %v3558_v33, 4 }
 0x15b   : > { %v2003_v47 = vrot.slane %v1982_v57, 4  ;;  %v1977_v41 = vperm.slane %v1973_v17, %v3771_v21  ;;  %v1984_v46 = vsel %vm521_vm1, %v1983_v12, %v854_v31  ;;  %v1555_v37 = vrot.slane %v4148_v56, 4 }
 0x15c   : > { %v984_v22 = vsel %vm521_vm1, %v474_v43, %v5396_v24  ;;  %v982_v58 = vsel %vm521_vm1, %v981_v1, %v3558_v33  ;;  %v1988_v27 = vperm.slane %v1984_v46, %v3771_v21  ;;  %v435_v5 = vsel %vm414_vm0, %v411_v26, %v3966_v9 }
 0x15d   : > { %v988_v16 = vperm.slane %v982_v58, %v3771_v21  ;;  %v992_v55 = vperm.slane %v984_v22, %v3771_v21  ;;  %v1989_v54 = vrot.slane %v1977_v41, 4  ;;  %v1992_v43 = vsel %vm521_vm1, %v1977_v41, %v1991_v15 }
 0x15e   : > { %v1641_v0 = vrot.slane %v435_v5, 4  ;;  %v5397_v31 = vrot.slane %v3468_v18, 4  ;;  %v2000_v12 = vperm.slane %v1992_v43, %v4012_v8  ;;  %v2001_v33 = vrot.slane %v1988_v27, 4 }
 0x15f   : > { %v2004_v1 = vsel %vm521_vm1, %v1988_v27, %v2003_v47  ;;  %v993_v17 = vrot.slane %v988_v16, 4  ;;  %v1990_v24 = vsel %vm521_vm1, %v1989_v54, %v1971_v20  ;;  %v5398_v9 = vrot.slane %v3917_v49, 4 }
 0x160   : > { %v1644_v6 = vsel %vm521_vm1, %v435_v5, %v5397_v31  ;;  %v2012_v22 = vperm.slane %v2004_v1, %v4012_v8  ;;  %v1005_v15 = vrot.slane %v992_v55, 4  ;;  %v1996_v41 = vperm.slane %v1990_v24, %v4012_v8 }
 0x161   : > { %v996_v26 = vsel %vm521_vm1, %v988_v16, %v5398_v9  ;;  %v2002_v46 = vsel %vm521_vm1, %v2001_v33, %v1982_v57  ;;  %v2019_v58 = vrot.slane %v2000_v12, 4  ;;  %v994_v47 = vsel %vm521_vm1, %v993_v17, %v3917_v49 }
 0x162   : > { %v2008_v27 = vperm.slane %v2002_v46, %v4012_v8  ;;  %v2017_v20 = vrot.slane %v2012_v22, 4  ;;  %v1000_v5 = vperm.slane %v994_v47, %v4012_v8  ;;  %v1004_v54 = vperm.slane %v996_v26, %v4012_v8 }
 0x163   : > { %v2015_v16 = vrot.slane %v1996_v41, 4  ;;  %v2020_v43 = vsel %vm521_vm1, %v2012_v22, %v2019_v58  ;;  %v1006_v31 = vsel %vm521_vm1, %v1005_v15, %v3903_v29  ;;  %v5399_v57 = vrot.slane %v3903_v29, 4 }
 0x164   : > { %v2013_v49 = vrot.slane %v2008_v27, 4  ;;  %v2018_v1 = vsel %vm521_vm1, %v2017_v20, %v2000_v12  ;;  %2900 = vst.msk [vmem:[%s4131_s15 + $0x220] sm:$0xff] %vm2831_vm2, %v2020_v43  ;;  %v1012_v17 = vperm.slane %v1006_v31, %v4012_v8  ;;  %v1017_v22 = vrot.slane %v1000_v5, 4 }
 0x165   : > { %v1008_v33 = vsel %vm521_vm1, %v992_v55, %v5399_v57  ;;  %v2016_v9 = vsel %vm521_vm1, %v2008_v27, %v2015_v16  ;;  %2879 = vst.msk [vmem:[%s4131_s15 + $0x178] sm:$0xff] %vm2831_vm2, %v2018_v1  ;;  %v1019_v26 = vrot.slane %v1004_v54, 4  ;;  %v1642_v29 = vsel %vm521_vm1, %v1641_v0, %v3468_v18  ;;  %v409_v18 = vpop.permute.xlu0 %408 }
 0x166   : > { %v1016_v24 = vperm.slane %v1008_v33, %v4012_v8  ;;  %v2014_v55 = vsel %vm521_vm1, %v2013_v49, %v1996_v41  ;;  %2858 = vst.msk [vmem:[%s4131_s15 + $0xd0] sm:$0xff] %vm2831_vm2, %v2016_v9  ;;  %v1021_v12 = vrot.slane %v1012_v17, 4  ;;  %v4215_v46 = vperm.slane %v1642_v29, %v3771_v21 }
 0x167   : > { %2837 = vst.msk [vmem:[%s4131_s15 + $0x28] sm:$0xff] %vm2831_vm2, %v2014_v55  ;;  %v1018_v58 = vsel %vm521_vm1, 0.0, %v1017_v22  ;;  %v1020_v47 = vsel %vm521_vm1, 0.0, %v1019_v26  ;;  %v2129_v27 = vsel %vm521_vm1, %v1019_v26, %v1000_v5  ;;  %v4223_v20 = vperm.slane %v1644_v6, %v3771_v21  ;;  %v480_v5 = vpop.permute.xlu2 %479 }
 0x168   : > { %v1023_v15 = vrot.slane %v1016_v24, 4  ;;  %v1022_v0 = vsel %vm521_vm1, 0.0, %v1021_v12  ;;  %v2133_v54 = vperm.slane %v2129_v27, %v3771_v21  ;;  %v2134_v16 = vrot.slane %v1020_v47, 4 }
 0x169   : > { %v1667_v57 = vrot.slane %v4215_v46, 4  ;;  %v1679_v33 = vrot.slane %v4223_v20, 4  ;;  %v434_v24 = vsel %vm414_vm0, %v3909_v2, %v409_v18  ;;  %v5400_v26 = vrot.slane %v3471_v19, 4  ;;  %v3139_v2 = vld [vmem:[%s3371_s14 + $0x130] sm:$0xff]  ;;  %s3160_s14 = scalar_lea.hbm %s5298_s1, 5376 }
 0x16a   : > { %v1024_v41 = vsel %vm521_vm1, 0.0, %v1023_v15  ;;  %v2140_v43 = vsel %vm521_vm1, %v1023_v15, %v1012_v17  ;;  %v2135_v6 = vsel %vm521_vm1, %v2134_v16, %v1018_v58  ;;  %v2153_v1 = vrot.slane %v2133_v54, 4  ;;  %p3162_p7 = scmp.lt.s32.totalorder %s3160_s14, %s3156_s4 }
 0x16b   : > { %v2145_v31 = vrot.slane %v1024_v41, 4  ;;  %v2144_v49 = vperm.slane %v2140_v43, %v3771_v21  ;;  %v2139_v9 = vperm.slane %v2135_v6, %v3771_v21  ;;  %v1585_v17 = vrot.slane %v434_v24, 4 }
 0x16c   : > { %v1588_v29 = vsel %vm521_vm1, %v434_v24, %v5400_v26  ;;  %v1149_v58 = vrot.slane %v480_v5, 4  ;;  %p3163_p8 = por %p3162_p7, %p3161_p6 }
 0x16d   : > { %v2146_v22 = vsel %vm521_vm1, %v2145_v31, %v1022_v0  ;;  %v2165_v12 = vrot.slane %v2144_v49, 4  ;;  %v4242_v15 = vperm.slane %v1588_v29, %v3771_v21  ;;  %v2151_v47 = vrot.slane %v2139_v9, 4 }
 0x16e   : > { %v2150_v55 = vperm.slane %v2146_v22, %v3771_v21  ;;  %v2154_v27 = vsel %vm521_vm1, %v2139_v9, %v2153_v1  ;;  %v1586_v18 = vsel %vm521_vm1, %v1585_v17, %v3139_v2  ;;  %v5401_v0 = vrot.slane %v3572_v36, 4  ;;  %v460_v22 = vpop.permute.xlu1 %459  ;;  %p3164_p10 = pnand %p3163_p8, %p3159_p5 }
 0x16f   : > { %v2162_v19 = vperm.slane %v2154_v27, %v4012_v8  ;;  %v4253_v31 = vperm.slane %v1586_v18, %v3771_v21  ;;  %v2152_v6 = vsel %vm521_vm1, %v2151_v47, %v2133_v54  ;;  %v1623_v1 = vrot.slane %v4242_v15, 4 }
 0x170   : > { %v1152_v41 = vsel %vm521_vm1, %v480_v5, %v5401_v0  ;;  %v2163_v16 = vrot.slane %v2150_v55, 4  ;;  %v2166_v43 = vsel %vm521_vm1, %v2150_v55, %v2165_v12  ;;  %v1150_v9 = vsel %vm521_vm1, %v1149_v58, %v3572_v36 }
 0x171   : > { %v2174_v24 = vperm.slane %v2166_v43, %v4012_v8  ;;  %v2158_v5 = vperm.slane %v2152_v6, %v4012_v8  ;;  %v2181_v26 = vrot.slane %v2162_v19, 4  ;;  %v1611_v29 = vrot.slane %v4253_v31, 4 }
 0x172   : > { %v2164_v17 = vsel %vm521_vm1, %v2163_v16, %v2144_v49  ;;  %v1156_v12 = vperm.slane %v1150_v9, %v3771_v21  ;;  %v1160_v47 = vperm.slane %v1152_v41, %v3771_v21  ;;  %v589_v58 = vrot.slane %v460_v22, 4 }
 0x173   : > { %v2170_v55 = vperm.slane %v2164_v17, %v4012_v8  ;;  %v2179_v54 = vrot.slane %v2174_v24, 4  ;;  %v2177_v27 = vrot.slane %v2158_v5, 4  ;;  %v2182_v36 = vsel %vm521_vm1, %v2174_v24, %v2181_v26  ;;  %v4283_v26 = vpop.permute.xlu0 %457 }
 0x174   : > { %v5402_v2 = vrot.slane %v3591_v42, 4  ;;  %2903 = vst.msk [vmem:[%s4131_s15 + $0x238] sm:$0xff] %vm2831_vm2, %v2182_v36  ;;  %v1161_v16 = vrot.slane %v1156_v12, 4  ;;  %v5403_v43 = vrot.slane %v3979_v48, 4  ;;  %v1173_v9 = vrot.slane %v1160_v47, 4 }
 0x175   : > { %v2175_v18 = vrot.slane %v2170_v55, 4  ;;  %v2180_v0 = vsel %vm521_vm1, %v2179_v54, %v2162_v19  ;;  %v2178_v6 = vsel %vm521_vm1, %v2170_v55, %v2177_v27 }
 0x176   : > { %v592_v49 = vsel %vm521_vm1, %v460_v22, %v5402_v2  ;;  %v1164_v41 = vsel %vm521_vm1, %v1156_v12, %v5403_v43  ;;  %2882 = vst.msk [vmem:[%s4131_s15 + $0x190] sm:$0xff] %vm2831_vm2, %v2180_v0  ;;  %v5404_v22 = vrot.slane %v3969_v61, 4  ;;  %v1162_v54 = vsel %vm521_vm1, %v1161_v16, %v3979_v48 }
 0x177   : > { %v1172_v24 = vperm.slane %v1164_v41, %v4012_v8  ;;  %v2176_v19 = vsel %vm521_vm1, %v2175_v18, %v2158_v5  ;;  %2861 = vst.msk [vmem:[%s4131_s15 + $0xe8] sm:$0xff] %vm2831_vm2, %v2178_v6  ;;  %v590_v12 = vsel %vm521_vm1, %v589_v58, %v3591_v42  ;;  %v1168_v27 = vperm.slane %v1162_v54, %v4012_v8 }
 0x178   : > { %v1176_v17 = vsel %vm521_vm1, %v1160_v47, %v5404_v22  ;;  %2840 = vst.msk [vmem:[%s4131_s15 + $0x40] sm:$0xff] %vm2831_vm2, %v2176_v19  ;;  %v1174_v47 = vsel %vm521_vm1, %v1173_v9, %v3969_v61  ;;  %v596_v5 = vperm.slane %v590_v12, %v3771_v21  ;;  %v600_v48 = vperm.slane %v592_v49, %v3771_v21 }
 0x179   : > { %v1184_v55 = vperm.slane %v1176_v17, %v4012_v8  ;;  %v1187_v36 = vrot.slane %v1172_v24, 4  ;;  %v1180_v2 = vperm.slane %v1174_v47, %v4012_v8  ;;  %v533_v0 = vrot.slane %v4283_v26, 4 }
 0x17a   : > { %v1185_v16 = vrot.slane %v1168_v27, 4  ;;  %v601_v43 = vrot.slane %v596_v5, 4 }
 0x17b   : > { %v1191_v18 = vrot.slane %v1184_v55, 4  ;;  %v1188_v42 = vsel %vm521_vm1, 0.0, %v1187_v36  ;;  %v2291_v58 = vsel %vm521_vm1, %v1187_v36, %v1168_v27  ;;  %v1189_v41 = vrot.slane %v1180_v2, 4 }
 0x17c   : > { %v2295_v61 = vperm.slane %v2291_v58, %v3771_v21  ;;  %v2296_v24 = vrot.slane %v1188_v42, 4  ;;  %v1186_v9 = vsel %vm521_vm1, 0.0, %v1185_v16  ;;  %v602_v49 = vsel %vm521_vm1, %v601_v43, %v3842_v30 }
 0x17d   : > { %v1192_v6 = vsel %vm521_vm1, 0.0, %v1191_v18  ;;  %v2302_v22 = vsel %vm521_vm1, %v1191_v18, %v1180_v2  ;;  %v1190_v19 = vsel %vm521_vm1, 0.0, %v1189_v41  ;;  %v5405_v36 = vrot.slane %v3842_v30, 4 }
 0x17e   : > { %v2307_v17 = vrot.slane %v1192_v6, 4  ;;  %v2297_v54 = vsel %vm521_vm1, %v2296_v24, %v1186_v9  ;;  %v2306_v55 = vperm.slane %v2302_v22, %v3771_v21  ;;  %v2315_v12 = vrot.slane %v2295_v61, 4 }
 0x17f   : > { %v2301_v27 = vperm.slane %v2297_v54, %v3771_v21  ;;  %v604_v16 = vsel %vm521_vm1, %v596_v5, %v5405_v36  ;;  %v608_v2 = vperm.slane %v602_v49, %v4012_v8  ;;  %v613_v43 = vrot.slane %v600_v48, 4 }
 0x180   : > { %v2308_v47 = vsel %vm521_vm1, %v2307_v17, %v1190_v19  ;;  %v2327_v42 = vrot.slane %v2306_v55, 4  ;;  %v612_v58 = vperm.slane %v604_v16, %v4012_v8  ;;  %v5406_v24 = vrot.slane %v3831_v45, 4 }
 0x181   : > { %v2312_v18 = vperm.slane %v2308_v47, %v3771_v21  ;;  %v2313_v41 = vrot.slane %v2301_v27, 4  ;;  %v2316_v6 = vsel %vm521_vm1, %v2301_v27, %v2315_v12  ;;  %v625_v22 = vrot.slane %v608_v2, 4 }
 0x182   : > { %v616_v9 = vsel %vm521_vm1, %v600_v48, %v5406_v24  ;;  %v2324_v30 = vperm.slane %v2316_v6, %v4012_v8  ;;  %v614_v49 = vsel %vm521_vm1, %v613_v43, %v3831_v45  ;;  %v534_v24 = vsel %vm521_vm1, %v533_v0, %v3576_v38 }
 0x183   : > { %v2325_v17 = vrot.slane %v2312_v18, 4  ;;  %v2328_v5 = vsel %vm521_vm1, %v2312_v18, %v2327_v42  ;;  %v2314_v19 = vsel %vm521_vm1, %v2313_v41, %v2295_v61  ;;  %v620_v47 = vperm.slane %v614_v49, %v4012_v8 }
 0x184   : > { %v2336_v54 = vperm.slane %v2328_v5, %v4012_v8  ;;  %v624_v12 = vperm.slane %v616_v9, %v4012_v8  ;;  %v2320_v48 = vperm.slane %v2314_v19, %v4012_v8  ;;  %v2343_v36 = vrot.slane %v2324_v30, 4 }
 0x185   : > { %v2326_v27 = vsel %vm521_vm1, %v2325_v17, %v2306_v55  ;;  %v626_v16 = vsel %vm521_vm1, 0.0, %v625_v22  ;;  %v627_v42 = vrot.slane %v612_v58, 4  ;;  %v629_v61 = vrot.slane %v620_v47, 4 }
 0x186   : > { %v2332_v18 = vperm.slane %v2326_v27, %v4012_v8  ;;  %v2341_v45 = vrot.slane %v2336_v54, 4  ;;  %v2339_v43 = vrot.slane %v2320_v48, 4  ;;  %v2344_v41 = vsel %vm521_vm1, %v2336_v54, %v2343_v36 }
 0x187   : > { %v631_v6 = vrot.slane %v624_v12, 4  ;;  %2906 = vst.msk [vmem:[%s4131_s15 + $0x250] sm:$0xff] %vm2831_vm2, %v2344_v41  ;;  %v628_v22 = vsel %vm521_vm1, 0.0, %v627_v42  ;;  %v630_v17 = vsel %vm521_vm1, 0.0, %v629_v61  ;;  %v1751_v49 = vsel %vm521_vm1, %v627_v42, %v608_v2 }
 0x188   : > { %v2337_v9 = vrot.slane %v2332_v18, 4  ;;  %v2342_v55 = vsel %vm521_vm1, %v2341_v45, %v2324_v30  ;;  %v2340_v58 = vsel %vm521_vm1, %v2332_v18, %v2339_v43  ;;  %v1756_v19 = vrot.slane %v628_v22, 4 }
 0x189   : > { %2885 = vst.msk [vmem:[%s4131_s15 + $0x1a8] sm:$0xff] %vm2831_vm2, %v2342_v55  ;;  %v632_v5 = vsel %vm521_vm1, 0.0, %v631_v6  ;;  %v1755_v30 = vperm.slane %v1751_v49, %v3771_v21  ;;  %v1762_v54 = vsel %vm521_vm1, %v631_v6, %v620_v47  ;;  %v5407_v18 = vrot.slane %v3576_v38, 4 }
 0x18a   : > { %v2338_v0 = vsel %vm521_vm1, %v2337_v9, %v2320_v48  ;;  %2864 = vst.msk [vmem:[%s4131_s15 + $0x100] sm:$0xff] %vm2831_vm2, %v2340_v58  ;;  %v1767_v12 = vrot.slane %v632_v5, 4  ;;  %v1757_v27 = vsel %vm521_vm1, %v1756_v19, %v626_v16  ;;  %v1766_v36 = vperm.slane %v1762_v54, %v3771_v21 }
 0x18b   : > { %2843 = vst.msk [vmem:[%s4131_s15 + $0x58] sm:$0xff] %vm2831_vm2, %v2338_v0  ;;  %v536_v2 = vsel %vm521_vm1, %v4283_v26, %v5407_v18  ;;  %v540_v48 = vperm.slane %v534_v24, %v3771_v21  ;;  %v1761_v45 = vperm.slane %v1757_v27, %v3771_v21  ;;  %v1775_v61 = vrot.slane %v1755_v30, 4 }
 0x18c   : > { %v1768_v42 = vsel %vm521_vm1, %v1767_v12, %v630_v17  ;;  %v544_v47 = vperm.slane %v536_v2, %v3771_v21  ;;  %v1787_v41 = vrot.slane %v1766_v36, 4  ;;  %v5408_v6 = vrot.slane %v3819_v52, 4 }
 0x18d   : > { %v1772_v43 = vperm.slane %v1768_v42, %v3771_v21  ;;  %v545_v16 = vrot.slane %v540_v48, 4  ;;  %v1773_v9 = vrot.slane %v1761_v45, 4  ;;  %v1776_v26 = vsel %vm521_vm1, %v1761_v45, %v1775_v61 }
 0x18e   : > { %v548_v38 = vsel %vm521_vm1, %v540_v48, %v5408_v6  ;;  %v557_v55 = vrot.slane %v544_v47, 4  ;;  %v1784_v22 = vperm.slane %v1776_v26, %v4012_v8  ;;  %v5409_v2 = vrot.slane %v3794_v23, 4 }
 0x18f   : > { %v556_v24 = vperm.slane %v548_v38, %v4012_v8  ;;  %v1785_v17 = vrot.slane %v1772_v43, 4  ;;  %v1788_v58 = vsel %vm521_vm1, %v1772_v43, %v1787_v41  ;;  %v546_v5 = vsel %vm521_vm1, %v545_v16, %v3819_v52  ;;  %v486_v38 = vpop.permute.xlu2 %485 }
 0x190   : > { %v1774_v49 = vsel %vm521_vm1, %v1773_v9, %v1755_v30  ;;  %v1796_v19 = vperm.slane %v1788_v58, %v4012_v8  ;;  %v552_v0 = vperm.slane %v546_v5, %v4012_v8  ;;  %v558_v54 = vsel %vm521_vm1, %v557_v55, %v3794_v23 }
 0x191   : > { %v1780_v12 = vperm.slane %v1774_v49, %v4012_v8  ;;  %v1786_v27 = vsel %vm521_vm1, %v1785_v17, %v1766_v36  ;;  %v1803_v18 = vrot.slane %v1784_v22, 4  ;;  %v560_v48 = vsel %vm521_vm1, %v544_v47, %v5409_v2 }
 0x192   : > { %v1792_v52 = vperm.slane %v1786_v27, %v4012_v8  ;;  %v1801_v30 = vrot.slane %v1796_v19, 4  ;;  %v564_v45 = vperm.slane %v558_v54, %v4012_v8  ;;  %v568_v42 = vperm.slane %v560_v48, %v4012_v8 }
 0x193   : > { %v1799_v61 = vrot.slane %v1780_v12, 4  ;;  %v1804_v43 = vsel %vm521_vm1, %v1796_v19, %v1803_v18  ;;  %v569_v41 = vrot.slane %v552_v0, 4  ;;  %v571_v16 = vrot.slane %v556_v24, 4  ;;  %v466_v24 = vpop.permute.xlu1 %465 }
 0x194   : > { %v1797_v36 = vrot.slane %v1792_v52, 4  ;;  %v1802_v6 = vsel %vm521_vm1, %v1801_v30, %v1784_v22  ;;  %2896 = vst.msk [vmem:[%s4131_s15 + $0x200] sm:$0xff] %vm2831_vm2, %v1804_v43  ;;  %v573_v23 = vrot.slane %v564_v45, 4  ;;  %v575_v47 = vrot.slane %v568_v42, 4 }
 0x195   : > { %v1800_v9 = vsel %vm521_vm1, %v1792_v52, %v1799_v61  ;;  %2875 = vst.msk [vmem:[%s4131_s15 + $0x158] sm:$0xff] %vm2831_vm2, %v1802_v6  ;;  %v570_v26 = vsel %vm521_vm1, 0.0, %v569_v41  ;;  %v572_v55 = vsel %vm521_vm1, 0.0, %v571_v16  ;;  %v1697_v17 = vsel %vm521_vm1, %v571_v16, %v552_v0 }
 0x196   : > { %v1798_v58 = vsel %vm521_vm1, %v1797_v36, %v1780_v12  ;;  %2854 = vst.msk [vmem:[%s4131_s15 + $0xb0] sm:$0xff] %vm2831_vm2, %v1800_v9  ;;  %v574_v22 = vsel %vm521_vm1, 0.0, %v573_v23  ;;  %v576_v5 = vsel %vm521_vm1, 0.0, %v575_v47  ;;  %v1701_v49 = vperm.slane %v1697_v17, %v3771_v21 }
 0x197   : > { %2833 = vst.msk [vmem:[%s4131_s15 + $0x8] sm:$0xff] %vm2831_vm2, %v1798_v58  ;;  %v1702_v19 = vrot.slane %v572_v55, 4  ;;  %v1708_v54 = vsel %vm521_vm1, %v575_v47, %v564_v45  ;;  %v1713_v27 = vrot.slane %v576_v5, 4  ;;  %v1317_v18 = vrot.slane %v486_v38, 4 }
 0x198   : > { %v1712_v0 = vperm.slane %v1708_v54, %v3771_v21  ;;  %v1721_v2 = vrot.slane %v1701_v49, 4  ;;  %v5410_v12 = vrot.slane %v3587_v40, 4  ;;  %v757_v52 = vrot.slane %v466_v24, 4 }
 0x199   : > { %v1703_v30 = vsel %vm521_vm1, %v1702_v19, %v570_v26  ;;  %v1714_v42 = vsel %vm521_vm1, %v1713_v27, %v574_v22  ;;  %v1318_v61 = vsel %vm521_vm1, %v1317_v18, %v3587_v40  ;;  %v5411_v23 = vrot.slane %v3995_v13, 4 }
 0x19a   : > { %v1320_v48 = vsel %vm521_vm1, %v486_v38, %v5410_v12  ;;  %v1707_v45 = vperm.slane %v1703_v30, %v3771_v21  ;;  %v1718_v41 = vperm.slane %v1714_v42, %v3771_v21  ;;  %v1733_v16 = vrot.slane %v1712_v0, 4 }
 0x19b   : > { %v1328_v43 = vperm.slane %v1320_v48, %v3771_v21  ;;  %v1324_v36 = vperm.slane %v1318_v61, %v3771_v21  ;;  %v758_v38 = vsel %vm521_vm1, %v757_v52, %v3533_v28  ;;  %v5412_v9 = vrot.slane %v3533_v28, 4 }
 0x19c   : > { %v1719_v26 = vrot.slane %v1707_v45, 4  ;;  %v1722_v55 = vsel %vm521_vm1, %v1707_v45, %v1721_v2  ;;  %v1731_v17 = vrot.slane %v1718_v41, 4  ;;  %v1734_v58 = vsel %vm521_vm1, %v1718_v41, %v1733_v16 }
 0x19d   : > { %v1341_v6 = vrot.slane %v1328_v43, 4  ;;  %v1344_v47 = vsel %vm521_vm1, %v1328_v43, %v5411_v23  ;;  %v760_v40 = vsel %vm521_vm1, %v466_v24, %v5412_v9  ;;  %v1730_v22 = vperm.slane %v1722_v55, %v4012_v8 }
 0x19e   : > { %v1742_v5 = vperm.slane %v1734_v58, %v4012_v8  ;;  %v1329_v19 = vrot.slane %v1324_v36, 4  ;;  %v5413_v54 = vrot.slane %v3998_v59, 4  ;;  %v1720_v18 = vsel %vm521_vm1, %v1719_v26, %v1701_v49 }
 0x19f   : > { %v1732_v28 = vsel %vm521_vm1, %v1731_v17, %v1712_v0  ;;  %v1342_v2 = vsel %vm521_vm1, %v1341_v6, %v3995_v13  ;;  %v1726_v12 = vperm.slane %v1720_v18, %v4012_v8  ;;  %v1749_v30 = vrot.slane %v1730_v22, 4 }
 0x1a0   : > { %v1332_v27 = vsel %vm521_vm1, %v1324_v36, %v5413_v54  ;;  %v1738_v48 = vperm.slane %v1732_v28, %v4012_v8  ;;  %v1747_v52 = vrot.slane %v1742_v5, 4  ;;  %v1330_v42 = vsel %vm521_vm1, %v1329_v19, %v3998_v59 }
 0x1a1   : > { %v1340_v24 = vperm.slane %v1332_v27, %v4012_v8  ;;  %v1348_v49 = vperm.slane %v1342_v2, %v4012_v8  ;;  %v1352_v61 = vperm.slane %v1344_v47, %v4012_v8  ;;  %v1745_v45 = vrot.slane %v1726_v12, 4 }
 0x1a2   : > { %v1743_v43 = vrot.slane %v1738_v48, 4  ;;  %v1748_v13 = vsel %vm521_vm1, %v1747_v52, %v1730_v22  ;;  %v1750_v41 = vsel %vm521_vm1, %v1742_v5, %v1749_v30  ;;  %v1336_v16 = vperm.slane %v1330_v42, %v4012_v8 }
 0x1a3   : > { %v1355_v0 = vrot.slane %v1340_v24, 4  ;;  %2874 = vst.msk [vmem:[%s4131_s15 + $0x150] sm:$0xff] %vm2831_vm2, %v1748_v13  ;;  %v1357_v59 = vrot.slane %v1348_v49, 4  ;;  %v1359_v6 = vrot.slane %v1352_v61, 4  ;;  %v1746_v47 = vsel %vm521_vm1, %v1738_v48, %v1745_v45 }
 0x1a4   : > { %v1744_v23 = vsel %vm521_vm1, %v1743_v43, %v1726_v12  ;;  %2895 = vst.msk [vmem:[%s4131_s15 + $0x1f8] sm:$0xff] %vm2831_vm2, %v1750_v41  ;;  %v764_v26 = vperm.slane %v758_v38, %v3771_v21  ;;  %v1353_v55 = vrot.slane %v1336_v16, 4  ;;  %v768_v27 = vperm.slane %v760_v40, %v3771_v21 }
 0x1a5   : > { %v1356_v36 = vsel %vm521_vm1, 0.0, %v1355_v0  ;;  %2832 = vst.msk [vmem:[%s4131_s15] sm:$0xff] %vm2831_vm2, %v1744_v23  ;;  %v1358_v17 = vsel %vm521_vm1, 0.0, %v1357_v59  ;;  %v1360_v58 = vsel %vm521_vm1, 0.0, %v1359_v6  ;;  %v2453_v22 = vsel %vm521_vm1, %v1355_v0, %v1336_v16 }
 0x1a6   : > { %v2458_v9 = vrot.slane %v1356_v36, 4  ;;  %2853 = vst.msk [vmem:[%s4131_s15 + $0xa8] sm:$0xff] %vm2831_vm2, %v1746_v47  ;;  %v2457_v5 = vperm.slane %v2453_v22, %v3771_v21  ;;  %v2464_v19 = vsel %vm521_vm1, %v1359_v6, %v1348_v49  ;;  %v2469_v54 = vrot.slane %v1360_v58, 4 }
 0x1a7   : > { %v1354_v38 = vsel %vm521_vm1, 0.0, %v1353_v55  ;;  %v2468_v18 = vperm.slane %v2464_v19, %v3771_v21  ;;  %v769_v28 = vrot.slane %v764_v26, 4  ;;  %v5414_v24 = vrot.slane %v3878_v10, 4 }
 0x1a8   : > { %v2459_v12 = vsel %vm521_vm1, %v2458_v9, %v1354_v38  ;;  %v2470_v48 = vsel %vm521_vm1, %v2469_v54, %v1358_v17  ;;  %v2477_v52 = vrot.slane %v2457_v5, 4  ;;  %v781_v43 = vrot.slane %v768_v27, 4 }
 0x1a9   : > { %v772_v2 = vsel %vm521_vm1, %v764_v26, %v5414_v24  ;;  %v2463_v42 = vperm.slane %v2459_v12, %v3771_v21  ;;  %v2474_v40 = vperm.slane %v2470_v48, %v3771_v21  ;;  %v2489_v49 = vrot.slane %v2468_v18, 4  ;;  %v464_v48 = vpop.permute.xlu0 %463 }
 0x1aa   : > { %v780_v30 = vperm.slane %v772_v2, %v4012_v8  ;;  %v770_v61 = vsel %vm521_vm1, %v769_v28, %v3878_v10  ;;  %v5415_v45 = vrot.slane %v3868_v62, 4  ;;  %v782_v10 = vsel %vm521_vm1, %v781_v43, %v3868_v62 }
 0x1ab   : > { %v776_v0 = vperm.slane %v770_v61, %v4012_v8  ;;  %v2475_v16 = vrot.slane %v2463_v42, 4  ;;  %v2478_v36 = vsel %vm521_vm1, %v2463_v42, %v2477_v52  ;;  %v2487_v59 = vrot.slane %v2474_v40, 4 }
 0x1ac   : > { %v784_v13 = vsel %vm521_vm1, %v768_v27, %v5415_v45  ;;  %v795_v41 = vrot.slane %v780_v30, 4  ;;  %v2490_v6 = vsel %vm521_vm1, %v2474_v40, %v2489_v49  ;;  %v2486_v23 = vperm.slane %v2478_v36, %v4012_v8  ;;  %v492_v49 = vpop.permute.xlu2 %491 }
 0x1ad   : > { %v2498_v47 = vperm.slane %v2490_v6, %v4012_v8  ;;  %v792_v9 = vperm.slane %v784_v13, %v4012_v8  ;;  %v2476_v26 = vsel %vm521_vm1, %v2475_v16, %v2457_v5  ;;  %v2488_v55 = vsel %vm521_vm1, %v2487_v59, %v2468_v18 }
 0x1ae   : > { %v788_v17 = vperm.slane %v782_v10, %v4012_v8  ;;  %v793_v58 = vrot.slane %v776_v0, 4  ;;  %v2482_v22 = vperm.slane %v2476_v26, %v4012_v8  ;;  %v2494_v19 = vperm.slane %v2488_v55, %v4012_v8 }
 0x1af   : > { %v2503_v54 = vrot.slane %v2498_v47, 4  ;;  %v2505_v27 = vrot.slane %v2486_v23, 4  ;;  %v796_v62 = vsel %vm521_vm1, 0.0, %v795_v41  ;;  %v799_v24 = vrot.slane %v792_v9, 4 }
 0x1b0   : > { %v794_v38 = vsel %vm521_vm1, 0.0, %v793_v58  ;;  %v797_v28 = vrot.slane %v788_v17, 4  ;;  %v2499_v5 = vrot.slane %v2494_v19, 4  ;;  %v2501_v18 = vrot.slane %v2482_v22, 4 }
 0x1b1   : > { %v2504_v2 = vsel %vm521_vm1, %v2503_v54, %v2486_v23  ;;  %v2506_v12 = vsel %vm521_vm1, %v2498_v47, %v2505_v27  ;;  %v800_v30 = vsel %vm521_vm1, 0.0, %v799_v24  ;;  %v1913_v42 = vsel %vm521_vm1, %v795_v41, %v776_v0  ;;  %v5416_v23 = vld [vmem:[#allocation15_spill] sm:$0xff] }
 0x1b2   : > { %2888 = vst.msk [vmem:[%s4131_s15 + $0x1c0] sm:$0xff] %vm2831_vm2, %v2504_v2  ;;  %v798_v52 = vsel %vm521_vm1, 0.0, %v797_v28  ;;  %v1918_v40 = vrot.slane %v796_v62, 4  ;;  %v2500_v61 = vsel %vm521_vm1, %v2499_v5, %v2482_v22  ;;  %v2502_v43 = vsel %vm521_vm1, %v2494_v19, %v2501_v18  ;;  %v5419_v5 = vld [vmem:[#allocation16_spill] sm:$0xff] }
 0x1b3   : > { %2909 = vst.msk [vmem:[%s4131_s15 + $0x268] sm:$0xff] %vm2831_vm2, %v2506_v12  ;;  %v1917_v45 = vperm.slane %v1913_v42, %v3771_v21  ;;  %v1924_v13 = vsel %vm521_vm1, %v799_v24, %v788_v17  ;;  %v1929_v59 = vrot.slane %v800_v30, 4  ;;  %v701_v0 = vrot.slane %v464_v48, 4 }
 0x1b4   : > { %2846 = vst.msk [vmem:[%s4131_s15 + $0x70] sm:$0xff] %vm2831_vm2, %v2500_v61  ;;  %v1919_v16 = vsel %vm521_vm1, %v1918_v40, %v794_v38  ;;  %v1928_v36 = vperm.slane %v1924_v13, %v3771_v21  ;;  %v5417_v47 = vrot.slane %v5416_v23, 4  ;;  %v1485_v9 = vrot.slane %v492_v49, 4 }
 0x1b5   : > { %2867 = vst.msk [vmem:[%s4131_s15 + $0x118] sm:$0xff] %vm2831_vm2, %v2502_v43  ;;  %v1923_v41 = vperm.slane %v1919_v16, %v3771_v21  ;;  %v1937_v6 = vrot.slane %v1917_v45, 4  ;;  %v1930_v26 = vsel %vm521_vm1, %v1929_v59, %v798_v52  ;;  %v702_v17 = vsel %vm521_vm1, %v701_v0, %v5416_v23 }
 0x1b6   : > { %v704_v10 = vsel %vm521_vm1, %v464_v48, %v5417_v47  ;;  %v1949_v55 = vrot.slane %v1928_v36, 4  ;;  %v1934_v22 = vperm.slane %v1930_v26, %v3771_v21  ;;  %v708_v27 = vperm.slane %v702_v17, %v3771_v21 }
 0x1b7   : > { %v712_v58 = vperm.slane %v704_v10, %v3771_v21  ;;  %v1935_v19 = vrot.slane %v1923_v41, 4  ;;  %v1938_v54 = vsel %vm521_vm1, %v1923_v41, %v1937_v6  ;;  %v5418_v28 = vrot.slane %v3845_v4, 4 }
 0x1b8   : > { %v1946_v38 = vperm.slane %v1938_v54, %v4012_v8  ;;  %v1486_v18 = vsel %vm521_vm1, %v1485_v9, %v5419_v5  ;;  %v1947_v12 = vrot.slane %v1934_v22, 4  ;;  %v1950_v48 = vsel %vm521_vm1, %v1934_v22, %v1949_v55 }
 0x1b9   : > { %v725_v62 = vrot.slane %v712_v58, 4  ;;  %v728_v24 = vsel %vm521_vm1, %v712_v58, %v5418_v28  ;;  %v1936_v2 = vsel %vm521_vm1, %v1935_v19, %v1917_v45  ;;  %v713_v52 = vrot.slane %v708_v27, 4 }
 0x1ba   : > { %v1942_v30 = vperm.slane %v1936_v2, %v4012_v8  ;;  %v1958_v42 = vperm.slane %v1950_v48, %v4012_v8  ;;  %v1965_v40 = vrot.slane %v1946_v38, 4  ;;  %v5420_v61 = vrot.slane %v3853_v51, 4 }
 0x1bb   : > { %v1948_v13 = vsel %vm521_vm1, %v1947_v12, %v1928_v36  ;;  %v714_v16 = vsel %vm521_vm1, %v713_v52, %v3853_v51  ;;  %v726_v59 = vsel %vm521_vm1, %v725_v62, %v3845_v4  ;;  %v736_v51 = vperm.slane %v728_v24, %v4012_v8 }
 0x1bc   : > { %v716_v43 = vsel %vm521_vm1, %v708_v27, %v5420_v61  ;;  %v1954_v0 = vperm.slane %v1948_v13, %v4012_v8  ;;  %v1961_v41 = vrot.slane %v1942_v30, 4  ;;  %v1963_v6 = vrot.slane %v1958_v42, 4 }
 0x1bd   : > { %v724_v45 = vperm.slane %v716_v43, %v4012_v8  ;;  %v1966_v23 = vsel %vm521_vm1, %v1958_v42, %v1965_v40  ;;  %v720_v36 = vperm.slane %v714_v16, %v4012_v8  ;;  %v732_v47 = vperm.slane %v726_v59, %v4012_v8 }
 0x1be   : > { %2899 = vst.msk [vmem:[%s4131_s15 + $0x218] sm:$0xff] %vm2831_vm2, %v1966_v23  ;;  %v1959_v9 = vrot.slane %v1954_v0, 4  ;;  %v1962_v4 = vsel %vm521_vm1, %v1954_v0, %v1961_v41  ;;  %v1964_v26 = vsel %vm521_vm1, %v1963_v6, %v1946_v38  ;;  %v5421_v55 = vrot.slane %v5419_v5, 4 }
 0x1bf   : > { %v739_v10 = vrot.slane %v724_v45, 4  ;;  %2857 = vst.msk [vmem:[%s4131_s15 + $0xc8] sm:$0xff] %vm2831_vm2, %v1962_v4  ;;  %v737_v58 = vrot.slane %v720_v36, 4  ;;  %v741_v19 = vrot.slane %v732_v47, 4  ;;  %v743_v54 = vrot.slane %v736_v51, 4 }
 0x1c0   : > { %v1488_v17 = vsel %vm521_vm1, %v492_v49, %v5421_v55  ;;  %v1960_v27 = vsel %vm521_vm1, %v1959_v9, %v1942_v30  ;;  %2878 = vst.msk [vmem:[%s4131_s15 + $0x170] sm:$0xff] %vm2831_vm2, %v1964_v26  ;;  %v1492_v38 = vperm.slane %v1486_v18, %v3771_v21  ;;  %v5422_v13 = vrot.slane %v4057_v60, 4 }
 0x1c1   : > { %v740_v22 = vsel %vm521_vm1, 0.0, %v739_v10  ;;  %v1859_v62 = vsel %vm521_vm1, %v739_v10, %v720_v36  ;;  %2836 = vst.msk [vmem:[%s4131_s15 + $0x20] sm:$0xff] %vm2831_vm2, %v1960_v27  ;;  %v738_v49 = vsel %vm521_vm1, 0.0, %v737_v58  ;;  %v742_v24 = vsel %vm521_vm1, 0.0, %v741_v19 }
 0x1c2   : > { %v1864_v28 = vrot.slane %v740_v22, 4  ;;  %v744_v5 = vsel %vm521_vm1, 0.0, %v743_v54  ;;  %v1863_v2 = vperm.slane %v1859_v62, %v3771_v21  ;;  %v1870_v48 = vsel %vm521_vm1, %v743_v54, %v732_v47 }
 0x1c3   : > { %v1875_v52 = vrot.slane %v744_v5, 4  ;;  %v1496_v30 = vperm.slane %v1488_v17, %v3771_v21  ;;  %v1874_v18 = vperm.slane %v1870_v48, %v3771_v21  ;;  %v1497_v61 = vrot.slane %v1492_v38, 4 }
 0x1c4   : > { %v1865_v12 = vsel %vm521_vm1, %v1864_v28, %v738_v49  ;;  %v1883_v40 = vrot.slane %v1863_v2, 4  ;;  %v1500_v16 = vsel %vm521_vm1, %v1492_v38, %v5422_v13  ;;  %v5423_v59 = vrot.slane %v4047_v14, 4 }
 0x1c5   : > { %v1869_v42 = vperm.slane %v1865_v12, %v3771_v21  ;;  %v1876_v43 = vsel %vm521_vm1, %v1875_v52, %v742_v24  ;;  %v1509_v45 = vrot.slane %v1496_v30, 4  ;;  %v1895_v36 = vrot.slane %v1874_v18, 4  ;;  %v472_v52 = vpop.permute.xlu1 %471 }
 0x1c6   : > { %v1512_v0 = vsel %vm521_vm1, %v1496_v30, %v5423_v59  ;;  %v1880_v41 = vperm.slane %v1876_v43, %v3771_v21  ;;  %v1498_v51 = vsel %vm521_vm1, %v1497_v61, %v4057_v60  ;;  %v1508_v10 = vperm.slane %v1500_v16, %v4012_v8 }
 0x1c7   : > { %v1881_v6 = vrot.slane %v1869_v42, 4  ;;  %v1884_v23 = vsel %vm521_vm1, %v1869_v42, %v1883_v40  ;;  %v1510_v9 = vsel %vm521_vm1, %v1509_v45, %v4047_v14  ;;  %v1504_v17 = vperm.slane %v1498_v51, %v4012_v8  ;;  %v5424_v51 = vld [vmem:[#allocation17_spill] sm:$0xff] }
 0x1c8   : > { %v1892_v47 = vperm.slane %v1884_v23, %v4012_v8  ;;  %v1893_v26 = vrot.slane %v1880_v41, 4  ;;  %v1896_v55 = vsel %vm521_vm1, %v1880_v41, %v1895_v36  ;;  %v1516_v60 = vperm.slane %v1510_v9, %v4012_v8 }
 0x1c9   : > { %v1882_v4 = vsel %vm521_vm1, %v1881_v6, %v1863_v2  ;;  %v1904_v22 = vperm.slane %v1896_v55, %v4012_v8  ;;  %v1520_v27 = vperm.slane %v1512_v0, %v4012_v8  ;;  %v1521_v14 = vrot.slane %v1504_v17, 4  ;;  %v470_v6 = vpop.permute.xlu0 %469 }
 0x1ca   : > { %v1888_v58 = vperm.slane %v1882_v4, %v4012_v8  ;;  %v1911_v19 = vrot.slane %v1892_v47, 4  ;;  %v1894_v54 = vsel %vm521_vm1, %v1893_v26, %v1874_v18  ;;  %v1523_v62 = vrot.slane %v1508_v10, 4 }
 0x1cb   : > { %v1900_v28 = vperm.slane %v1894_v54, %v4012_v8  ;;  %v1909_v49 = vrot.slane %v1904_v22, 4  ;;  %v1522_v5 = vsel %vm521_vm1, 0.0, %v1521_v14  ;;  %v1525_v12 = vrot.slane %v1516_v60, 4 }
 0x1cc   : > { %v1907_v38 = vrot.slane %v1888_v58, 4  ;;  %v1912_v24 = vsel %vm521_vm1, %v1904_v22, %v1911_v19  ;;  %v1524_v2 = vsel %vm521_vm1, 0.0, %v1523_v62  ;;  %v1527_v48 = vrot.slane %v1520_v27, 4 }
 0x1cd   : > { %2898 = vst.msk [vmem:[%s4131_s15 + $0x210] sm:$0xff] %vm2831_vm2, %v1912_v24  ;;  %v1905_v30 = vrot.slane %v1900_v28, 4  ;;  %v1910_v18 = vsel %vm521_vm1, %v1909_v49, %v1892_v47  ;;  %v2615_v40 = vsel %vm521_vm1, %v1523_v62, %v1504_v17  ;;  %v1526_v61 = vsel %vm521_vm1, 0.0, %v1525_v12 }
 0x1ce   : > { %v1908_v42 = vsel %vm521_vm1, %v1900_v28, %v1907_v38  ;;  %v1528_v43 = vsel %vm521_vm1, 0.0, %v1527_v48  ;;  %v2619_v13 = vperm.slane %v2615_v40, %v3771_v21  ;;  %v2620_v16 = vrot.slane %v1524_v2, 4  ;;  %2877 = vst.msk [vmem:[%s4131_s15 + $0x168] sm:$0xff] %vm2831_vm2, %v1910_v18 }
 0x1cf   : > { %2856 = vst.msk [vmem:[%s4131_s15 + $0xc0] sm:$0xff] %vm2831_vm2, %v1908_v42  ;;  %v1906_v45 = vsel %vm521_vm1, %v1905_v30, %v1888_v58  ;;  %v2626_v59 = vsel %vm521_vm1, %v1527_v48, %v1516_v60  ;;  %v2631_v0 = vrot.slane %v1528_v43, 4  ;;  %v925_v41 = vrot.slane %v472_v52, 4 }
 0x1d0   : > { %2835 = vst.msk [vmem:[%s4131_s15 + $0x18] sm:$0xff] %vm2831_vm2, %v1906_v45  ;;  %v2621_v23 = vsel %vm521_vm1, %v2620_v16, %v1522_v5  ;;  %v2630_v36 = vperm.slane %v2626_v59, %v3771_v21  ;;  %v2639_v47 = vrot.slane %v2619_v13, 4  ;;  %v5425_v10 = vrot.slane %v5424_v51, 4 }
 0x1d1   : > { %v2625_v4 = vperm.slane %v2621_v23, %v3771_v21  ;;  %v2632_v26 = vsel %vm521_vm1, %v2631_v0, %v1526_v61  ;;  %v926_v55 = vsel %vm521_vm1, %v925_v41, %v5424_v51  ;;  %v869_v60 = vrot.slane %v470_v6, 4 }
 0x1d2   : > { %v928_v9 = vsel %vm521_vm1, %v472_v52, %v5425_v10  ;;  %v2636_v58 = vperm.slane %v2632_v26, %v3771_v21  ;;  %v2651_v22 = vrot.slane %v2630_v36, 4  ;;  %v932_v19 = vperm.slane %v926_v55, %v3771_v21 }
 0x1d3   : > { %v936_v17 = vperm.slane %v928_v9, %v3771_v21  ;;  %v2637_v54 = vrot.slane %v2625_v4, 4  ;;  %v2640_v27 = vsel %vm521_vm1, %v2625_v4, %v2639_v47  ;;  %v5426_v62 = vrot.slane %v3922_v34, 4  ;;  %v5428_v4 = vld [vmem:[#allocation18_spill] sm:$0xff] }
 0x1d4   : > { %v2648_v38 = vperm.slane %v2640_v27, %v4012_v8  ;;  %v2649_v49 = vrot.slane %v2636_v58, 4  ;;  %v2652_v24 = vsel %vm521_vm1, %v2636_v58, %v2651_v22  ;;  %v937_v5 = vrot.slane %v932_v19, 4 }
 0x1d5   : > { %v949_v14 = vrot.slane %v936_v17, 4  ;;  %v952_v28 = vsel %vm521_vm1, %v936_v17, %v5426_v62  ;;  %v2638_v2 = vsel %vm521_vm1, %v2637_v54, %v2619_v13  ;;  %v2660_v12 = vperm.slane %v2652_v24, %v4012_v8 }
 0x1d6   : > { %v5427_v48 = vrot.slane %v3937_v35, 4  ;;  %v2644_v42 = vperm.slane %v2638_v2, %v4012_v8  ;;  %v2650_v18 = vsel %vm521_vm1, %v2649_v49, %v2630_v36  ;;  %v2667_v40 = vrot.slane %v2648_v38, 4 }
 0x1d7   : > { %v950_v30 = vsel %vm521_vm1, %v949_v14, %v3922_v34  ;;  %v938_v61 = vsel %vm521_vm1, %v937_v5, %v3937_v35  ;;  %v2656_v43 = vperm.slane %v2650_v18, %v4012_v8  ;;  %v2665_v13 = vrot.slane %v2660_v12, 4 }
 0x1d8   : > { %v940_v52 = vsel %vm521_vm1, %v932_v19, %v5427_v48  ;;  %v944_v16 = vperm.slane %v938_v61, %v4012_v8  ;;  %v2663_v59 = vrot.slane %v2644_v42, 4  ;;  %v2668_v34 = vsel %vm521_vm1, %v2660_v12, %v2667_v40 }
 0x1d9   : > { %v948_v45 = vperm.slane %v940_v52, %v4012_v8  ;;  %v956_v0 = vperm.slane %v950_v30, %v4012_v8  ;;  %v960_v41 = vperm.slane %v952_v28, %v4012_v8  ;;  %v2661_v23 = vrot.slane %v2656_v43, 4  ;;  %2912 = vst.msk [vmem:[%s4131_s15 + $0x280] sm:$0xff] %vm2831_vm2, %v2668_v34 }
 0x1da   : > { %v2666_v36 = vsel %vm521_vm1, %v2665_v13, %v2648_v38  ;;  %v961_v35 = vrot.slane %v944_v16, 4  ;;  %v2664_v51 = vsel %vm521_vm1, %v2656_v43, %v2663_v59  ;;  %v870_v26 = vsel %vm521_vm1, %v869_v60, %v5428_v4 }
 0x1db   : > { %v963_v47 = vrot.slane %v948_v45, 4  ;;  %2891 = vst.msk [vmem:[%s4131_s15 + $0x1d8] sm:$0xff] %vm2831_vm2, %v2666_v36  ;;  %v965_v10 = vrot.slane %v956_v0, 4  ;;  %v967_v9 = vrot.slane %v960_v41, 4  ;;  %v2662_v55 = vsel %vm521_vm1, %v2661_v23, %v2644_v42 }
 0x1dc   : > { %2870 = vst.msk [vmem:[%s4131_s15 + $0x130] sm:$0xff] %vm2831_vm2, %v2664_v51  ;;  %v962_v17 = vsel %vm521_vm1, 0.0, %v961_v35  ;;  %v5429_v28 = vrot.slane %v5428_v4, 4  ;;  %v876_v49 = vperm.slane %v870_v26, %v3771_v21  ;;  %v5430_v42 = vrot.slane %v3900_v3, 4 }
 0x1dd   : > { %v964_v58 = vsel %vm521_vm1, 0.0, %v963_v47  ;;  %v2075_v22 = vsel %vm521_vm1, %v963_v47, %v944_v16  ;;  %2849 = vst.msk [vmem:[%s4131_s15 + $0x88] sm:$0xff] %vm2831_vm2, %v2662_v55  ;;  %v966_v19 = vsel %vm521_vm1, 0.0, %v965_v10  ;;  %v968_v54 = vsel %vm521_vm1, 0.0, %v967_v9 }
 0x1de   : > { %v2079_v27 = vperm.slane %v2075_v22, %v3771_v21  ;;  %v2080_v14 = vrot.slane %v964_v58, 4  ;;  %v2086_v60 = vsel %vm521_vm1, %v967_v9, %v956_v0  ;;  %v2091_v62 = vrot.slane %v968_v54, 4 }
 0x1df   : > { %v872_v38 = vsel %vm521_vm1, %v470_v6, %v5429_v28  ;;  %v2090_v5 = vperm.slane %v2086_v60, %v3771_v21  ;;  %v881_v30 = vrot.slane %v876_v49, 4  ;;  %v884_v18 = vsel %vm521_vm1, %v876_v49, %v5430_v42 }
 0x1e0   : > { %v2081_v24 = vsel %vm521_vm1, %v2080_v14, %v962_v17  ;;  %v2099_v2 = vrot.slane %v2079_v27, 4  ;;  %v880_v12 = vperm.slane %v872_v38, %v3771_v21  ;;  %v2092_v52 = vsel %vm521_vm1, %v2091_v62, %v966_v19  ;;  %v498_v38 = vpop.permute.xlu2 %497 }
 0x1e1   : > { %v2085_v48 = vperm.slane %v2081_v24, %v3771_v21  ;;  %v2096_v6 = vperm.slane %v2092_v52, %v3771_v21  ;;  %v2111_v40 = vrot.slane %v2090_v5, 4  ;;  %v892_v61 = vperm.slane %v884_v18, %v4012_v8 }
 0x1e2   : > { %v893_v43 = vrot.slane %v880_v12, 4  ;;  %v882_v45 = vsel %vm521_vm1, %v881_v30, %v3900_v3  ;;  %v5431_v59 = vrot.slane %v3891_v44, 4 }
 0x1e3   : > { %v2097_v13 = vrot.slane %v2085_v48, 4  ;;  %v2100_v16 = vsel %vm521_vm1, %v2085_v48, %v2099_v2  ;;  %v2109_v41 = vrot.slane %v2096_v6, 4  ;;  %v2112_v23 = vsel %vm521_vm1, %v2096_v6, %v2111_v40 }
 0x1e4   : > { %v896_v34 = vsel %vm521_vm1, %v880_v12, %v5431_v59  ;;  %v2108_v0 = vperm.slane %v2100_v16, %v4012_v8  ;;  %v888_v36 = vperm.slane %v882_v45, %v4012_v8  ;;  %v2120_v47 = vperm.slane %v2112_v23, %v4012_v8  ;;  %v4720_v12 = vpop.permute.xlu1 %477 }
 0x1e5   : > { %v2098_v35 = vsel %vm521_vm1, %v2097_v13, %v2079_v27  ;;  %v894_v51 = vsel %vm521_vm1, %v893_v43, %v3891_v44  ;;  %v904_v3 = vperm.slane %v896_v34, %v4012_v8  ;;  %v2110_v9 = vsel %vm521_vm1, %v2109_v41, %v2090_v5 }
 0x1e6   : > { %v2104_v10 = vperm.slane %v2098_v35, %v4012_v8  ;;  %v2127_v4 = vrot.slane %v2108_v0, 4  ;;  %v900_v26 = vperm.slane %v894_v51, %v4012_v8  ;;  %v2116_v55 = vperm.slane %v2110_v9, %v4012_v8 }
 0x1e7   : > { %v2125_v17 = vrot.slane %v2120_v47, 4  ;;  %v905_v58 = vrot.slane %v888_v36, 4  ;;  %v907_v22 = vrot.slane %v892_v61, 4  ;;  %v911_v27 = vrot.slane %v904_v3, 4  ;;  %v5432_v61 = vld [vmem:[#allocation19_spill] sm:$0xff] }
 0x1e8   : > { %v2123_v19 = vrot.slane %v2104_v10, 4  ;;  %v2128_v54 = vsel %vm521_vm1, %v2120_v47, %v2127_v4  ;;  %v909_v44 = vrot.slane %v900_v26, 4  ;;  %v2121_v14 = vrot.slane %v2116_v55, 4 }
 0x1e9   : > { %v2126_v60 = vsel %vm521_vm1, %v2125_v17, %v2108_v0  ;;  %2902 = vst.msk [vmem:[%s4131_s15 + $0x230] sm:$0xff] %vm2831_vm2, %v2128_v54  ;;  %v906_v62 = vsel %vm521_vm1, 0.0, %v905_v58  ;;  %v908_v28 = vsel %vm521_vm1, 0.0, %v907_v22  ;;  %v912_v5 = vsel %vm521_vm1, 0.0, %v911_v27 }
 0x1ea   : > { %v2124_v49 = vsel %vm521_vm1, %v2116_v55, %v2123_v19  ;;  %2881 = vst.msk [vmem:[%s4131_s15 + $0x188] sm:$0xff] %vm2831_vm2, %v2126_v60  ;;  %v910_v24 = vsel %vm521_vm1, 0.0, %v909_v44  ;;  %v2021_v2 = vsel %vm521_vm1, %v907_v22, %v888_v36  ;;  %v2122_v48 = vsel %vm521_vm1, %v2121_v14, %v2104_v10 }
 0x1eb   : > { %2860 = vst.msk [vmem:[%s4131_s15 + $0xe0] sm:$0xff] %vm2831_vm2, %v2124_v49  ;;  %v2025_v52 = vperm.slane %v2021_v2, %v3771_v21  ;;  %v2026_v30 = vrot.slane %v908_v28, 4  ;;  %v2032_v42 = vsel %vm521_vm1, %v911_v27, %v900_v26  ;;  %v2037_v6 = vrot.slane %v912_v5, 4  ;;  %v5434_v26 = vld [vmem:[#allocation20_spill] sm:$0xff] }
 0x1ec   : > { %2839 = vst.msk [vmem:[%s4131_s15 + $0x38] sm:$0xff] %vm2831_vm2, %v2122_v48  ;;  %v2036_v18 = vperm.slane %v2032_v42, %v3771_v21  ;;  %v1653_v40 = vrot.slane %v498_v38, 4  ;;  %v5433_v43 = vrot.slane %v5432_v61, 4  ;;  %v1093_v34 = vrot.slane %v4720_v12, 4 }
 0x1ed   : > { %v2027_v16 = vsel %vm521_vm1, %v2026_v30, %v906_v62  ;;  %v2045_v45 = vrot.slane %v2025_v52, 4  ;;  %v2038_v41 = vsel %vm521_vm1, %v2037_v6, %v910_v24 }
 0x1ee   : > { %v1656_v13 = vsel %vm521_vm1, %v498_v38, %v5433_v43  ;;  %v2031_v0 = vperm.slane %v2027_v16, %v3771_v21  ;;  %v2057_v23 = vrot.slane %v2036_v18, 4  ;;  %v1654_v36 = vsel %vm521_vm1, %v1653_v40, %v5432_v61  ;;  %v4775_v43 = vpop.permute.xlu0 %475 }
 0x1ef   : > { %v1664_v59 = vperm.slane %v1656_v13, %v3771_v21  ;;  %v2042_v35 = vperm.slane %v2038_v41, %v3771_v21  ;;  %v1660_v47 = vperm.slane %v1654_v36, %v3771_v21  ;;  %v1094_v55 = vsel %vm521_vm1, %v1093_v34, %v5434_v26 }
 0x1f0   : > { %v2043_v10 = vrot.slane %v2031_v0, 4  ;;  %v2046_v9 = vsel %vm521_vm1, %v2031_v0, %v2045_v45 }
 0x1f1   : > { %v1677_v51 = vrot.slane %v1664_v59, 4  ;;  %v1680_v3 = vsel %vm521_vm1, %v1664_v59, %v1679_v33  ;;  %v2054_v17 = vperm.slane %v2046_v9, %v4012_v8  ;;  %v2055_v58 = vrot.slane %v2042_v35, 4 }
 0x1f2   : > { %v1688_v4 = vperm.slane %v1680_v3, %v4012_v8  ;;  %v2058_v22 = vsel %vm521_vm1, %v2042_v35, %v2057_v23  ;;  %v1665_v19 = vrot.slane %v1660_v47, 4  ;;  %v2044_v54 = vsel %vm521_vm1, %v2043_v10, %v2025_v52 }
 0x1f3   : > { %v2066_v44 = vperm.slane %v2058_v22, %v4012_v8  ;;  %v1668_v33 = vsel %vm521_vm1, %v1660_v47, %v1667_v57  ;;  %v1678_v27 = vsel %vm521_vm1, %v1677_v51, %v4223_v20  ;;  %v2050_v14 = vperm.slane %v2044_v54, %v4012_v8 }
 0x1f4   : > { %v2056_v60 = vsel %vm521_vm1, %v2055_v58, %v2036_v18  ;;  %v2073_v62 = vrot.slane %v2054_v17, 4  ;;  %v1666_v28 = vsel %vm521_vm1, %v1665_v19, %v4215_v46  ;;  %v1676_v57 = vperm.slane %v1668_v33, %v4012_v8 }
 0x1f5   : > { %v2062_v38 = vperm.slane %v2056_v60, %v4012_v8  ;;  %v2071_v49 = vrot.slane %v2066_v44, 4  ;;  %v1672_v24 = vperm.slane %v1666_v28, %v4012_v8  ;;  %v2069_v5 = vrot.slane %v2050_v14, 4 }
 0x1f6   : > { %v2074_v20 = vsel %vm521_vm1, %v2066_v44, %v2073_v62  ;;  %v1684_v2 = vperm.slane %v1678_v27, %v4012_v8  ;;  %v1695_v48 = vrot.slane %v1688_v4, 4  ;;  %v1691_v42 = vrot.slane %v1676_v57, 4 }
 0x1f7   : > { %v2067_v52 = vrot.slane %v2062_v38, 4  ;;  %v2072_v30 = vsel %vm521_vm1, %v2071_v49, %v2054_v17  ;;  %2901 = vst.msk [vmem:[%s4131_s15 + $0x228] sm:$0xff] %vm2831_vm2, %v2074_v20  ;;  %v1689_v46 = vrot.slane %v1672_v24, 4  ;;  %v2070_v18 = vsel %vm521_vm1, %v2062_v38, %v2069_v5 }
 0x1f8   : > { %2880 = vst.msk [vmem:[%s4131_s15 + $0x180] sm:$0xff] %vm2831_vm2, %v2072_v30  ;;  %v1693_v6 = vrot.slane %v1684_v2, 4  ;;  %v1696_v40 = vsel %vm521_vm1, 0.0, %v1695_v48  ;;  %v2788_v61 = vsel %vm521_vm1, %v1695_v48, %v1684_v2  ;;  %v1692_v45 = vsel %vm521_vm1, 0.0, %v1691_v42 }
 0x1f9   : > { %v2068_v13 = vsel %vm521_vm1, %v2067_v52, %v2050_v14  ;;  %2859 = vst.msk [vmem:[%s4131_s15 + $0xd8] sm:$0xff] %vm2831_vm2, %v2070_v18  ;;  %v1690_v16 = vsel %vm521_vm1, 0.0, %v1689_v46  ;;  %v2777_v59 = vsel %vm521_vm1, %v1691_v42, %v1672_v24  ;;  %v2782_v41 = vrot.slane %v1692_v45, 4 }
 0x1fa   : > { %2838 = vst.msk [vmem:[%s4131_s15 + $0x30] sm:$0xff] %vm2831_vm2, %v2068_v13  ;;  %v1694_v34 = vsel %vm521_vm1, 0.0, %v1693_v6  ;;  %v2781_v0 = vperm.slane %v2777_v59, %v3771_v21  ;;  %v2792_v23 = vperm.slane %v2788_v61, %v3771_v21  ;;  %v2793_v36 = vrot.slane %v1696_v40, 4 }
 0x1fb   : > { %v5435_v35 = vrot.slane %v5434_v26, 4  ;;  %v1100_v51 = vperm.slane %v1094_v55, %v3771_v21  ;;  %v1037_v3 = vrot.slane %v4775_v43, 4  ;;  %v2783_v10 = vsel %vm521_vm1, %v2782_v41, %v1690_v16 }
 0x1fc   : > { %v2801_v9 = vrot.slane %v2781_v0, 4  ;;  %v2813_v4 = vrot.slane %v2792_v23, 4  ;;  %v2787_v58 = vperm.slane %v2783_v10, %v3771_v21  ;;  %v2794_v22 = vsel %vm521_vm1, %v2793_v36, %v1694_v34 }
 0x1fd   : > { %v1096_v47 = vsel %vm521_vm1, %v4720_v12, %v5435_v35  ;;  %v1105_v19 = vrot.slane %v1100_v51, 4  ;;  %v5436_v26 = vrot.slane %v3982_v50, 4  ;;  %v2798_v12 = vperm.slane %v2794_v22, %v3771_v21  ;;  %v5438_v22 = vld [vmem:[#allocation21_spill] sm:$0xff] }
 0x1fe   : > { %v1104_v17 = vperm.slane %v1096_v47, %v3771_v21  ;;  %v5437_v33 = vrot.slane %v3985_v7, 4  ;;  %v2799_v14 = vrot.slane %v2787_v58, 4  ;;  %v2802_v60 = vsel %vm521_vm1, %v2787_v58, %v2801_v9 }
 0x1ff   : > { %v1108_v54 = vsel %vm521_vm1, %v1100_v51, %v5436_v26  ;;  %v1106_v62 = vsel %vm521_vm1, %v1105_v19, %v3982_v50  ;;  %v2810_v38 = vperm.slane %v2802_v60, %v4012_v8  ;;  %v2811_v49 = vrot.slane %v2798_v12, 4 }
 0x200   : > { %v1116_v55 = vperm.slane %v1108_v54, %v4012_v8  ;;  %v1117_v44 = vrot.slane %v1104_v17, 4  ;;  %v1120_v27 = vsel %vm521_vm1, %v1104_v17, %v5437_v33  ;;  %v2814_v24 = vsel %vm521_vm1, %v2798_v12, %v2813_v4  ;;  %v4838_v4 = vpop.permute.xlu1 %483 }
 0x201   : > { %v1128_v28 = vperm.slane %v1120_v27, %v4012_v8  ;;  %v1112_v57 = vperm.slane %v1106_v62, %v4012_v8  ;;  %v2800_v5 = vsel %vm521_vm1, %v2799_v14, %v2781_v0  ;;  %v2822_v20 = vperm.slane %v2814_v24, %v4012_v8 }
 0x202   : > { %v1118_v2 = vsel %vm521_vm1, %v1117_v44, %v3985_v7  ;;  %v1131_v48 = vrot.slane %v1116_v55, 4  ;;  %v2806_v50 = vperm.slane %v2800_v5, %v4012_v8  ;;  %v2812_v52 = vsel %vm521_vm1, %v2811_v49, %v2792_v23 }
 0x203   : > { %v2829_v30 = vrot.slane %v2810_v38, 4  ;;  %v1124_v46 = vperm.slane %v1118_v2, %v4012_v8  ;;  %v2818_v42 = vperm.slane %v2812_v52, %v4012_v8  ;;  %v2827_v18 = vrot.slane %v2822_v20, 4 }
 0x204   : > { %v1129_v6 = vrot.slane %v1112_v57, 4  ;;  %v1132_v40 = vsel %vm521_vm1, 0.0, %v1131_v48  ;;  %v2825_v61 = vrot.slane %v2806_v50, 4  ;;  %v1135_v16 = vrot.slane %v1128_v28, 4 }
 0x205   : > { %v2830_v7 = vsel %vm521_vm1, %v2822_v20, %v2829_v30  ;;  %v1133_v13 = vrot.slane %v1124_v46, 4  ;;  %v2823_v45 = vrot.slane %v2818_v42, 4  ;;  %v2828_v59 = vsel %vm521_vm1, %v2827_v18, %v2810_v38 }
 0x206   : > { %2915 = vst.msk [vmem:[%s4131_s15 + $0x298] sm:$0xff] %vm2831_vm2, %v2830_v7  ;;  %v1130_v34 = vsel %vm521_vm1, 0.0, %v1129_v6  ;;  %v2237_v0 = vsel %vm521_vm1, %v1131_v48, %v1112_v57  ;;  %v2826_v41 = vsel %vm521_vm1, %v2818_v42, %v2825_v61  ;;  %v1136_v36 = vsel %vm521_vm1, 0.0, %v1135_v16 }
 0x207   : > { %2894 = vst.msk [vmem:[%s4131_s15 + $0x1f0] sm:$0xff] %vm2831_vm2, %v2828_v59  ;;  %v1134_v23 = vsel %vm521_vm1, 0.0, %v1133_v13  ;;  %v2241_v35 = vperm.slane %v2237_v0, %v3771_v21  ;;  %v2824_v47 = vsel %vm521_vm1, %v2823_v45, %v2806_v50  ;;  %v2242_v51 = vrot.slane %v1132_v40, 4 }
 0x208   : > { %2873 = vst.msk [vmem:[%s4131_s15 + $0x148] sm:$0xff] %vm2831_vm2, %v2826_v41  ;;  %v2248_v10 = vsel %vm521_vm1, %v1135_v16, %v1124_v46  ;;  %v2253_v9 = vrot.slane %v1136_v36, 4  ;;  %v1038_v19 = vsel %vm521_vm1, %v1037_v3, %v5438_v22  ;;  %v5439_v26 = vrot.slane %v5438_v22, 4 }
 0x209   : > { %2852 = vst.msk [vmem:[%s4131_s15 + $0xa0] sm:$0xff] %vm2831_vm2, %v2824_v47  ;;  %v2252_v17 = vperm.slane %v2248_v10, %v3771_v21  ;;  %v2261_v58 = vrot.slane %v2241_v35, 4  ;;  %v2243_v12 = vsel %vm521_vm1, %v2242_v51, %v1130_v34  ;;  %v1044_v44 = vperm.slane %v1038_v19, %v3771_v21 }
 0x20a   : > { %v1040_v54 = vsel %vm521_vm1, %v4775_v43, %v5439_v26  ;;  %v2254_v55 = vsel %vm521_vm1, %v2253_v9, %v1134_v23  ;;  %v2247_v27 = vperm.slane %v2243_v12, %v3771_v21  ;;  %v1261_v3 = vrot.slane %v4838_v4, 4 }
 0x20b   : > { %v1048_v33 = vperm.slane %v1040_v54, %v3771_v21  ;;  %v2258_v14 = vperm.slane %v2254_v55, %v3771_v21  ;;  %v2273_v60 = vrot.slane %v2252_v17, 4  ;;  %v1049_v62 = vrot.slane %v1044_v44, 4  ;;  %v4895_v54 = vpop.permute.xlu0 %481 }
 0x20c   : > { %v5440_v28 = vrot.slane %v3948_v53, 4  ;;  %v5441_v49 = vrot.slane %v3942_v39, 4  ;;  %v2259_v57 = vrot.slane %v2247_v27, 4  ;;  %v2262_v5 = vsel %vm521_vm1, %v2247_v27, %v2261_v58 }
 0x20d   : > { %v1061_v38 = vrot.slane %v1048_v33, 4  ;;  %v2271_v20 = vrot.slane %v2258_v14, 4  ;;  %v2274_v2 = vsel %vm521_vm1, %v2258_v14, %v2273_v60  ;;  %v2270_v48 = vperm.slane %v2262_v5, %v4012_v8 }
 0x20e   : > { %v1052_v43 = vsel %vm521_vm1, %v1044_v44, %v5440_v28  ;;  %v1064_v24 = vsel %vm521_vm1, %v1048_v33, %v5441_v49  ;;  %v2282_v50 = vperm.slane %v2274_v2, %v4012_v8  ;;  %v1050_v52 = vsel %vm521_vm1, %v1049_v62, %v3948_v53  ;;  %v5442_v33 = vld [vmem:[#allocation22_spill] sm:$0xff] }
 0x20f   : > { %v1060_v30 = vperm.slane %v1052_v43, %v4012_v8  ;;  %v2260_v46 = vsel %vm521_vm1, %v2259_v57, %v2241_v35  ;;  %v2272_v42 = vsel %vm521_vm1, %v2271_v20, %v2252_v17  ;;  %v1056_v18 = vperm.slane %v1050_v52, %v4012_v8 }
 0x210   : > { %v1062_v6 = vsel %vm521_vm1, %v1061_v38, %v3942_v39  ;;  %v2266_v40 = vperm.slane %v2260_v46, %v4012_v8  ;;  %v2278_v61 = vperm.slane %v2272_v42, %v4012_v8  ;;  %v2287_v7 = vrot.slane %v2282_v50, 4 }
 0x211   : > { %v2289_v13 = vrot.slane %v2270_v48, 4  ;;  %v1068_v53 = vperm.slane %v1062_v6, %v4012_v8  ;;  %v1072_v16 = vperm.slane %v1064_v24, %v4012_v8  ;;  %v1073_v45 = vrot.slane %v1056_v18, 4 }
 0x212   : > { %v1075_v59 = vrot.slane %v1060_v30, 4  ;;  %v2283_v34 = vrot.slane %v2278_v61, 4  ;;  %v2285_v0 = vrot.slane %v2266_v40, 4  ;;  %v2288_v41 = vsel %vm521_vm1, %v2287_v7, %v2270_v48  ;;  %v5445_v30 = vld [vmem:[#allocation14_spill] sm:$0xff] }
 0x213   : > { %v2290_v39 = vsel %vm521_vm1, %v2282_v50, %v2289_v13  ;;  %2884 = vst.msk [vmem:[%s4131_s15 + $0x1a0] sm:$0xff] %vm2831_vm2, %v2288_v41  ;;  %v1074_v23 = vsel %vm521_vm1, 0.0, %v1073_v45  ;;  %v1077_v35 = vrot.slane %v1068_v53, 4  ;;  %v1079_v47 = vrot.slane %v1072_v16, 4 }
 0x214   : > { %v1076_v36 = vsel %vm521_vm1, 0.0, %v1075_v59  ;;  %v2284_v51 = vsel %vm521_vm1, %v2283_v34, %v2266_v40  ;;  %v2286_v10 = vsel %vm521_vm1, %v2278_v61, %v2285_v0  ;;  %2905 = vst.msk [vmem:[%s4131_s15 + $0x248] sm:$0xff] %vm2831_vm2, %v2290_v39  ;;  %v2183_v9 = vsel %vm521_vm1, %v1075_v59, %v1056_v18 }
 0x215   : > { %v2188_v17 = vrot.slane %v1076_v36, 4  ;;  %2842 = vst.msk [vmem:[%s4131_s15 + $0x50] sm:$0xff] %vm2831_vm2, %v2284_v51  ;;  %v1078_v58 = vsel %vm521_vm1, 0.0, %v1077_v35  ;;  %v1080_v22 = vsel %vm521_vm1, 0.0, %v1079_v47  ;;  %v2187_v19 = vperm.slane %v2183_v9, %v3771_v21 }
 0x216   : > { %v2194_v26 = vsel %vm521_vm1, %v1079_v47, %v1068_v53  ;;  %2863 = vst.msk [vmem:[%s4131_s15 + $0xf8] sm:$0xff] %vm2831_vm2, %v2286_v10  ;;  %v2199_v44 = vrot.slane %v1080_v22, 4  ;;  %v1262_v27 = vsel %vm521_vm1, %v1261_v3, %v5442_v33  ;;  %v5443_v62 = vrot.slane %v5442_v33, 4 }
 0x217   : > { %v2189_v12 = vsel %vm521_vm1, %v2188_v17, %v1074_v23  ;;  %v2198_v55 = vperm.slane %v2194_v26, %v3771_v21  ;;  %v2207_v60 = vrot.slane %v2187_v19, 4  ;;  %v1268_v43 = vperm.slane %v1262_v27, %v3771_v21 }
 0x218   : > { %v2193_v14 = vperm.slane %v2189_v12, %v3771_v21  ;;  %v1264_v28 = vsel %vm521_vm1, %v4838_v4, %v5443_v62  ;;  %v2200_v38 = vsel %vm521_vm1, %v2199_v44, %v1078_v58  ;;  %v1205_v57 = vrot.slane %v4895_v54, 4  ;;  %v5447_v58 = vld [vmem:[#allocation23_spill] sm:$0xff]  ;;  %v490_v44 = vpop.permute.xlu1 %489 }
 0x219   : > { %v2219_v49 = vrot.slane %v2198_v55, 4  ;;  %v1272_v24 = vperm.slane %v1264_v28, %v3771_v21  ;;  %v2204_v5 = vperm.slane %v2200_v38, %v3771_v21  ;;  %v1273_v2 = vrot.slane %v1268_v43, 4 }
 0x21a   : > { %v2205_v3 = vrot.slane %v2193_v14, 4  ;;  %v2208_v20 = vsel %vm521_vm1, %v2193_v14, %v2207_v60  ;;  %v5444_v50 = vrot.slane %v4001_v11, 4  ;;  %v5446_v46 = vrot.slane %v5445_v30, 4 }
 0x21b   : > { %v2216_v48 = vperm.slane %v2208_v20, %v4012_v8  ;;  %v1285_v52 = vrot.slane %v1272_v24, 4  ;;  %v2217_v6 = vrot.slane %v2204_v5, 4  ;;  %v2220_v40 = vsel %vm521_vm1, %v2204_v5, %v2219_v49 }
 0x21c   : > { %v1276_v4 = vsel %vm521_vm1, %v1268_v43, %v5444_v50  ;;  %v1288_v42 = vsel %vm521_vm1, %v1272_v24, %v5446_v46  ;;  %v2206_v18 = vsel %vm521_vm1, %v2205_v3, %v2187_v19  ;;  %v1274_v61 = vsel %vm521_vm1, %v1273_v2, %v4001_v11  ;;  %v5449_v46 = vld [vmem:[#allocation29_spill] sm:$0xff] }
 0x21d   : > { %v2212_v7 = vperm.slane %v2206_v18, %v4012_v8  ;;  %v2228_v13 = vperm.slane %v2220_v40, %v4012_v8  ;;  %v2235_v53 = vrot.slane %v2216_v48, 4  ;;  %v1280_v16 = vperm.slane %v1274_v61, %v4012_v8  ;;  %v5451_v61 = vld [vmem:[#allocation24_spill] sm:$0xff] }
 0x21e   : > { %v2218_v45 = vsel %vm521_vm1, %v2217_v6, %v2198_v55  ;;  %v1284_v59 = vperm.slane %v1276_v4, %v4012_v8  ;;  %v1286_v34 = vsel %vm521_vm1, %v1285_v52, %v5445_v30  ;;  %v1296_v0 = vperm.slane %v1288_v42, %v4012_v8 }
 0x21f   : > { %v2224_v41 = vperm.slane %v2218_v45, %v4012_v8  ;;  %v2231_v11 = vrot.slane %v2212_v7, 4  ;;  %v2233_v39 = vrot.slane %v2228_v13, 4  ;;  %v2236_v23 = vsel %vm521_vm1, %v2228_v13, %v2235_v53 }
 0x220   : > { %2904 = vst.msk [vmem:[%s4131_s15 + $0x240] sm:$0xff] %vm2831_vm2, %v2236_v23  ;;  %v1292_v36 = vperm.slane %v1286_v34, %v4012_v8  ;;  %v1297_v35 = vrot.slane %v1280_v16, 4  ;;  %v1299_v47 = vrot.slane %v1284_v59, 4  ;;  %v1303_v51 = vrot.slane %v1296_v0, 4 }
 0x221   : > { %v2229_v10 = vrot.slane %v2224_v41, 4  ;;  %v2232_v9 = vsel %vm521_vm1, %v2224_v41, %v2231_v11  ;;  %v2234_v17 = vsel %vm521_vm1, %v2233_v39, %v2216_v48  ;;  %v1206_v22 = vsel %vm521_vm1, %v1205_v57, %v5447_v58 }
 0x222   : > { %2862 = vst.msk [vmem:[%s4131_s15 + $0xf0] sm:$0xff] %vm2831_vm2, %v2232_v9  ;;  %v1298_v19 = vsel %vm521_vm1, 0.0, %v1297_v35  ;;  %v1300_v26 = vsel %vm521_vm1, 0.0, %v1299_v47  ;;  %v1301_v12 = vrot.slane %v1292_v36, 4  ;;  %v1304_v55 = vsel %vm521_vm1, 0.0, %v1303_v51 }
 0x223   : > { %v2230_v33 = vsel %vm521_vm1, %v2229_v10, %v2212_v7  ;;  %2883 = vst.msk [vmem:[%s4131_s15 + $0x198] sm:$0xff] %vm2831_vm2, %v2234_v17  ;;  %v2399_v27 = vsel %vm521_vm1, %v1299_v47, %v1280_v16  ;;  %v2404_v14 = vrot.slane %v1300_v26, 4  ;;  %v2410_v60 = vsel %vm521_vm1, %v1303_v51, %v1292_v36  ;;  %v5452_v36 = vld [vmem:[#allocation28_spill] sm:$0xff] }
 0x224   : > { %2841 = vst.msk [vmem:[%s4131_s15 + $0x48] sm:$0xff] %vm2831_vm2, %v2230_v33  ;;  %v1302_v62 = vsel %vm521_vm1, 0.0, %v1301_v12  ;;  %v2403_v28 = vperm.slane %v2399_v27, %v3771_v21  ;;  %v2414_v43 = vperm.slane %v2410_v60, %v3771_v21  ;;  %v2415_v38 = vrot.slane %v1304_v55, 4 }
 0x225   : > { %v2405_v49 = vsel %vm521_vm1, %v2404_v14, %v1298_v19  ;;  %v5448_v24 = vrot.slane %v5447_v58, 4  ;;  %v1212_v5 = vperm.slane %v1206_v22, %v3771_v21  ;;  %v1429_v3 = vrot.slane %v490_v44, 4 }
 0x226   : > { %v2409_v20 = vperm.slane %v2405_v49, %v3771_v21  ;;  %v2416_v2 = vsel %vm521_vm1, %v2415_v38, %v1302_v62  ;;  %v2423_v48 = vrot.slane %v2403_v28, 4  ;;  %v2435_v50 = vrot.slane %v2414_v43, 4 }
 0x227   : > { %v1208_v57 = vsel %vm521_vm1, %v4895_v54, %v5448_v24  ;;  %v2420_v4 = vperm.slane %v2416_v2, %v3771_v21  ;;  %v1217_v30 = vrot.slane %v1212_v5, 4  ;;  %v5450_v42 = vrot.slane %v5449_v46, 4 }
 0x228   : > { %v1216_v52 = vperm.slane %v1208_v57, %v3771_v21  ;;  %v2421_v6 = vrot.slane %v2409_v20, 4  ;;  %v2424_v54 = vsel %vm521_vm1, %v2409_v20, %v2423_v48  ;;  %v1430_v7 = vsel %vm521_vm1, %v1429_v3, %v5451_v61 }
 0x229   : > { %v1220_v18 = vsel %vm521_vm1, %v1212_v5, %v5450_v42  ;;  %v2432_v13 = vperm.slane %v2424_v54, %v4012_v8  ;;  %v2433_v53 = vrot.slane %v2420_v4, 4  ;;  %v2436_v16 = vsel %vm521_vm1, %v2420_v4, %v2435_v50  ;;  %v5008_v5 = vpop.permute.xlu0 %487 }
 0x22a   : > { %v1228_v40 = vperm.slane %v1220_v18, %v4012_v8  ;;  %v1218_v45 = vsel %vm521_vm1, %v1217_v30, %v5449_v46  ;;  %v2422_v59 = vsel %vm521_vm1, %v2421_v6, %v2403_v28  ;;  %v2444_v34 = vperm.slane %v2436_v16, %v4012_v8  ;;  %v5455_v18 = vld [vmem:[#allocation25_spill] sm:$0xff]  ;;  %v5457_v16 = vld [vmem:[#allocation32_spill] sm:$0xff] }
 0x22b   : > { %v1224_v0 = vperm.slane %v1218_v45, %v4012_v8  ;;  %v1229_v41 = vrot.slane %v1216_v52, 4  ;;  %v2428_v11 = vperm.slane %v2422_v59, %v4012_v8  ;;  %v2434_v39 = vsel %vm521_vm1, %v2433_v53, %v2414_v43 }
 0x22c   : > { %v2451_v23 = vrot.slane %v2432_v13, 4  ;;  %v5453_v35 = vrot.slane %v5452_v36, 4  ;;  %v2440_v51 = vperm.slane %v2434_v39, %v4012_v8  ;;  %v2449_v10 = vrot.slane %v2444_v34, 4 }
 0x22d   : > { %v1230_v9 = vsel %vm521_vm1, %v1229_v41, %v5452_v36  ;;  %v2447_v58 = vrot.slane %v2428_v11, 4  ;;  %v1241_v26 = vrot.slane %v1224_v0, 4  ;;  %v1243_v33 = vrot.slane %v1228_v40, 4 }
 0x22e   : > { %v1232_v47 = vsel %vm521_vm1, %v1216_v52, %v5453_v35  ;;  %v2452_v22 = vsel %vm521_vm1, %v2444_v34, %v2451_v23  ;;  %v1236_v19 = vperm.slane %v1230_v9, %v4012_v8  ;;  %v2445_v12 = vrot.slane %v2440_v51, 4 }
 0x22f   : > { %v1240_v17 = vperm.slane %v1232_v47, %v4012_v8  ;;  %v2450_v55 = vsel %vm521_vm1, %v2449_v10, %v2432_v13  ;;  %2908 = vst.msk [vmem:[%s4131_s15 + $0x260] sm:$0xff] %vm2831_vm2, %v2452_v22  ;;  %v2448_v14 = vsel %vm521_vm1, %v2440_v51, %v2447_v58  ;;  %v1242_v60 = vsel %vm521_vm1, 0.0, %v1241_v26 }
 0x230   : > { %2887 = vst.msk [vmem:[%s4131_s15 + $0x1b8] sm:$0xff] %vm2831_vm2, %v2450_v55  ;;  %v1245_v62 = vrot.slane %v1236_v19, 4  ;;  %v5454_v28 = vrot.slane %v5451_v61, 4  ;;  %v2446_v38 = vsel %vm521_vm1, %v2445_v12, %v2428_v11  ;;  %v1244_v49 = vsel %vm521_vm1, 0.0, %v1243_v33 }
 0x231   : > { %v1247_v27 = vrot.slane %v1240_v17, 4  ;;  %2866 = vst.msk [vmem:[%s4131_s15 + $0x110] sm:$0xff] %vm2831_vm2, %v2448_v14  ;;  %v2345_v57 = vsel %vm521_vm1, %v1243_v33, %v1224_v0  ;;  %v2350_v2 = vrot.slane %v1244_v49, 4  ;;  %v1436_v4 = vperm.slane %v1430_v7, %v3771_v21 }
 0x232   : > { %v1432_v43 = vsel %vm521_vm1, %v490_v44, %v5454_v28  ;;  %2845 = vst.msk [vmem:[%s4131_s15 + $0x68] sm:$0xff] %vm2831_vm2, %v2446_v38  ;;  %v1246_v3 = vsel %vm521_vm1, 0.0, %v1245_v62  ;;  %v2349_v20 = vperm.slane %v2345_v57, %v3771_v21  ;;  %v1373_v42 = vrot.slane %v5008_v5, 4 }
 0x233   : > { %v1248_v24 = vsel %vm521_vm1, 0.0, %v1247_v27  ;;  %v2356_v44 = vsel %vm521_vm1, %v1247_v27, %v1236_v19  ;;  %v1440_v52 = vperm.slane %v1432_v43, %v3771_v21  ;;  %v2351_v30 = vsel %vm521_vm1, %v2350_v2, %v1242_v60 }
 0x234   : > { %v2360_v48 = vperm.slane %v2356_v44, %v3771_v21  ;;  %v2361_v50 = vrot.slane %v1248_v24, 4  ;;  %v2369_v46 = vrot.slane %v2349_v20, 4  ;;  %v5456_v6 = vrot.slane %v5455_v18, 4 }
 0x235   : > { %v2355_v40 = vperm.slane %v2351_v30, %v3771_v21  ;;  %v1441_v53 = vrot.slane %v1436_v4, 4  ;;  %v5458_v45 = vrot.slane %v5457_v16, 4  ;;  %v1453_v34 = vrot.slane %v1440_v52, 4 }
 0x236   : > { %v1376_v54 = vsel %vm521_vm1, %v5008_v5, %v5456_v6  ;;  %v2362_v61 = vsel %vm521_vm1, %v2361_v50, %v1246_v3  ;;  %v2381_v13 = vrot.slane %v2360_v48, 4  ;;  %v1456_v0 = vsel %vm521_vm1, %v1440_v52, %v1455_v32 }
 0x237   : > { %v2366_v7 = vperm.slane %v2362_v61, %v3771_v21  ;;  %v1444_v59 = vsel %vm521_vm1, %v1436_v4, %v5458_v45  ;;  %v2367_v41 = vrot.slane %v2355_v40, 4  ;;  %v2370_v11 = vsel %vm521_vm1, %v2355_v40, %v2369_v46 }
 0x238   : > { %v1442_v39 = vsel %vm521_vm1, %v1441_v53, %v5457_v16  ;;  %v1452_v23 = vperm.slane %v1444_v59, %v4012_v8  ;;  %v2378_v36 = vperm.slane %v2370_v11, %v4012_v8  ;;  %v1454_v32 = vsel %vm521_vm1, %v1453_v34, %v4080_v63 }
 0x239   : > { %v2379_v35 = vrot.slane %v2366_v7, 4  ;;  %v2382_v47 = vsel %vm521_vm1, %v2366_v7, %v2381_v13  ;;  %v1448_v51 = vperm.slane %v1442_v39, %v4012_v8  ;;  %v2368_v10 = vsel %vm521_vm1, %v2367_v41, %v2349_v20  ;;  %v5061_v20 = vpop.permute.xlu1 %495 }
 0x23a   : > { %v2390_v9 = vperm.slane %v2382_v47, %v4012_v8  ;;  %v1464_v17 = vperm.slane %v1456_v0, %v4012_v8  ;;  %v2374_v58 = vperm.slane %v2368_v10, %v4012_v8  ;;  %v2397_v19 = vrot.slane %v2378_v36, 4  ;;  %v5459_v0 = vld [vmem:[#allocation31_spill] sm:$0xff] }
 0x23b   : > { %v2380_v22 = vsel %vm521_vm1, %v2379_v35, %v2360_v48  ;;  %v1460_v26 = vperm.slane %v1454_v32, %v4012_v8  ;;  %v1465_v33 = vrot.slane %v1448_v51, 4  ;;  %v1467_v27 = vrot.slane %v1452_v23, 4 }
 0x23c   : > { %v2386_v12 = vperm.slane %v2380_v22, %v4012_v8  ;;  %v2395_v55 = vrot.slane %v2390_v9, 4  ;;  %v2393_v14 = vrot.slane %v2374_v58, 4  ;;  %v2398_v63 = vsel %vm521_vm1, %v2390_v9, %v2397_v19 }
 0x23d   : > { %v1469_v60 = vrot.slane %v1460_v26, 4  ;;  %v1471_v62 = vrot.slane %v1464_v17, 4  ;;  %2907 = vst.msk [vmem:[%s4131_s15 + $0x258] sm:$0xff] %vm2831_vm2, %v2398_v63  ;;  %v1466_v38 = vsel %vm521_vm1, 0.0, %v1465_v33  ;;  %v1468_v49 = vsel %vm521_vm1, 0.0, %v1467_v27 }
 0x23e   : > { %v2391_v28 = vrot.slane %v2386_v12, 4  ;;  %v2396_v43 = vsel %vm521_vm1, %v2395_v55, %v2378_v36  ;;  %v2394_v24 = vsel %vm521_vm1, %v2386_v12, %v2393_v14  ;;  %v2561_v3 = vsel %vm521_vm1, %v1467_v27, %v1448_v51 }
 0x23f   : > { %2886 = vst.msk [vmem:[%s4131_s15 + $0x1b0] sm:$0xff] %vm2831_vm2, %v2396_v43  ;;  %v1470_v57 = vsel %vm521_vm1, 0.0, %v1469_v60  ;;  %v1472_v5 = vsel %vm521_vm1, 0.0, %v1471_v62  ;;  %v2565_v44 = vperm.slane %v2561_v3, %v3771_v21  ;;  %v2566_v48 = vrot.slane %v1468_v49, 4 }
 0x240   : > { %v2392_v2 = vsel %vm521_vm1, %v2391_v28, %v2374_v58  ;;  %2865 = vst.msk [vmem:[%s4131_s15 + $0x108] sm:$0xff] %vm2831_vm2, %v2394_v24  ;;  %v2572_v50 = vsel %vm521_vm1, %v1471_v62, %v1460_v26  ;;  %v2577_v52 = vrot.slane %v1472_v5, 4  ;;  %v1374_v30 = vsel %vm521_vm1, %v1373_v42, %v5455_v18 }
 0x241   : > { %2844 = vst.msk [vmem:[%s4131_s15 + $0x60] sm:$0xff] %vm2831_vm2, %v2392_v2  ;;  %v2576_v4 = vperm.slane %v2572_v50, %v3771_v21  ;;  %v1384_v46 = vperm.slane %v1376_v54, %v3771_v21  ;;  %v2567_v6 = vsel %vm521_vm1, %v2566_v48, %v1466_v38  ;;  %v2585_v40 = vrot.slane %v2565_v44, 4  ;;  %v5461_v54 = vld [vmem:[#allocation30_spill] sm:$0xff] }
 0x242   : > { %v1380_v61 = vperm.slane %v1374_v30, %v3771_v21  ;;  %v1597_v13 = vrot.slane %v5061_v20, 4  ;;  %v2571_v53 = vperm.slane %v2567_v6, %v3771_v21  ;;  %v2578_v7 = vsel %vm521_vm1, %v2577_v52, %v1470_v57  ;;  %v494_v30 = vpop.permute.xlu0 %493 }
 0x243   : > { %v2597_v16 = vrot.slane %v2576_v4, 4  ;;  %v1397_v45 = vrot.slane %v1384_v46, 4  ;;  %v2582_v59 = vperm.slane %v2578_v7, %v3771_v21  ;;  %v5460_v42 = vrot.slane %v5459_v0, 4 }
 0x244   : > { %v1385_v34 = vrot.slane %v1380_v61, 4  ;;  %v5462_v41 = vrot.slane %v5461_v54, 4  ;;  %v2583_v39 = vrot.slane %v2571_v53, 4  ;;  %v2586_v23 = vsel %vm521_vm1, %v2571_v53, %v2585_v40  ;;  %v5463_v40 = vld [vmem:[#allocation26_spill] sm:$0xff] }
 0x245   : > { %v1388_v18 = vsel %vm521_vm1, %v1380_v61, %v5460_v42  ;;  %v1398_v35 = vsel %vm521_vm1, %v1397_v45, %v5461_v54  ;;  %v2594_v47 = vperm.slane %v2586_v23, %v4012_v8  ;;  %v2595_v51 = vrot.slane %v2582_v59, 4 }
 0x246   : > { %v1400_v11 = vsel %vm521_vm1, %v1384_v46, %v5462_v41  ;;  %v1396_v36 = vperm.slane %v1388_v18, %v4012_v8  ;;  %v2598_v10 = vsel %vm521_vm1, %v2582_v59, %v2597_v16  ;;  %v1386_v9 = vsel %vm521_vm1, %v1385_v34, %v5459_v0 }
 0x247   : > { %v2584_v32 = vsel %vm521_vm1, %v2583_v39, %v2565_v44  ;;  %v2606_v17 = vperm.slane %v2598_v10, %v4012_v8  ;;  %v1392_v58 = vperm.slane %v1386_v9, %v4012_v8  ;;  %v1404_v22 = vperm.slane %v1398_v35, %v4012_v8 }
 0x248   : > { %v2590_v19 = vperm.slane %v2584_v32, %v4012_v8  ;;  %v2596_v26 = vsel %vm521_vm1, %v2595_v51, %v2576_v4  ;;  %v2613_v12 = vrot.slane %v2594_v47, 4  ;;  %v1408_v55 = vperm.slane %v1400_v11, %v4012_v8 }
 0x249   : > { %v2602_v33 = vperm.slane %v2596_v26, %v4012_v8  ;;  %v2611_v27 = vrot.slane %v2606_v17, 4  ;;  %v1409_v14 = vrot.slane %v1392_v58, 4  ;;  %v1411_v63 = vrot.slane %v1396_v36, 4 }
 0x24a   : > { %v2609_v60 = vrot.slane %v2590_v19, 4  ;;  %v2614_v62 = vsel %vm521_vm1, %v2606_v17, %v2613_v12  ;;  %v1413_v28 = vrot.slane %v1404_v22, 4  ;;  %v1415_v43 = vrot.slane %v1408_v55, 4 }
 0x24b   : > { %v2607_v38 = vrot.slane %v2602_v33, 4  ;;  %v2612_v49 = vsel %vm521_vm1, %v2611_v27, %v2594_v47  ;;  %2911 = vst.msk [vmem:[%s4131_s15 + $0x278] sm:$0xff] %vm2831_vm2, %v2614_v62  ;;  %v1410_v24 = vsel %vm521_vm1, 0.0, %v1409_v14  ;;  %v1412_v57 = vsel %vm521_vm1, 0.0, %v1411_v63 }
 0x24c   : > { %v2610_v5 = vsel %vm521_vm1, %v2602_v33, %v2609_v60  ;;  %2890 = vst.msk [vmem:[%s4131_s15 + $0x1d0] sm:$0xff] %vm2831_vm2, %v2612_v49  ;;  %v1414_v3 = vsel %vm521_vm1, 0.0, %v1413_v28  ;;  %v1416_v2 = vsel %vm521_vm1, 0.0, %v1415_v43  ;;  %v2507_v44 = vsel %vm521_vm1, %v1411_v63, %v1392_v58 }
 0x24d   : > { %v2608_v48 = vsel %vm521_vm1, %v2607_v38, %v2590_v19  ;;  %2869 = vst.msk [vmem:[%s4131_s15 + $0x128] sm:$0xff] %vm2831_vm2, %v2610_v5  ;;  %v2511_v50 = vperm.slane %v2507_v44, %v3771_v21  ;;  %v2512_v4 = vrot.slane %v1412_v57, 4  ;;  %v2518_v52 = vsel %vm521_vm1, %v1415_v43, %v1404_v22 }
 0x24e   : > { %2848 = vst.msk [vmem:[%s4131_s15 + $0x80] sm:$0xff] %vm2831_vm2, %v2608_v48  ;;  %v2522_v46 = vperm.slane %v2518_v52, %v3771_v21  ;;  %v2523_v6 = vrot.slane %v1416_v2, 4  ;;  %v1598_v61 = vsel %vm521_vm1, %v1597_v13, %v5463_v40  ;;  %v5464_v53 = vrot.slane %v5463_v40, 4 }
 0x24f   : > { %v2513_v16 = vsel %vm521_vm1, %v2512_v4, %v1410_v24  ;;  %v2531_v45 = vrot.slane %v2511_v50, 4  ;;  %v1604_v59 = vperm.slane %v1598_v61, %v3771_v21  ;;  %v1541_v54 = vrot.slane %v494_v30, 4  ;;  %v5465_v4 = vld [vmem:[#allocation27_spill] sm:$0xff] }
 0x250   : > { %v1600_v7 = vsel %vm521_vm1, %v5061_v20, %v5464_v53  ;;  %v2517_v0 = vperm.slane %v2513_v16, %v3771_v21  ;;  %v2524_v42 = vsel %vm521_vm1, %v2523_v6, %v1414_v3  ;;  %v2543_v18 = vrot.slane %v2522_v46, 4 }
 0x251   : > { %v1608_v34 = vperm.slane %v1600_v7, %v3771_v21  ;;  %v2528_v13 = vperm.slane %v2524_v42, %v3771_v21  ;;  %v1609_v41 = vrot.slane %v1604_v59, 4  ;;  %v1612_v20 = vsel %vm521_vm1, %v1604_v59, %v1611_v29 }
 0x252   : > { %v2529_v39 = vrot.slane %v2517_v0, 4  ;;  %v2532_v23 = vsel %vm521_vm1, %v2517_v0, %v2531_v45  ;;  %v1620_v36 = vperm.slane %v1612_v20, %v4012_v8  ;;  %v1542_v52 = vsel %vm521_vm1, %v1541_v54, %v5465_v4 }
 0x253   : > { %v1621_v11 = vrot.slane %v1608_v34, 4  ;;  %v1624_v35 = vsel %vm521_vm1, %v1608_v34, %v1623_v1  ;;  %v2540_v47 = vperm.slane %v2532_v23, %v4012_v8  ;;  %v2541_v51 = vrot.slane %v2528_v13, 4 }
 0x254   : > { %v2544_v10 = vsel %vm521_vm1, %v2528_v13, %v2543_v18  ;;  %v1610_v9 = vsel %vm521_vm1, %v1609_v41, %v4253_v31  ;;  %v2530_v29 = vsel %vm521_vm1, %v2529_v39, %v2511_v50  ;;  %v1632_v55 = vperm.slane %v1624_v35, %v4012_v8 }
 0x255   : > { %v2552_v32 = vperm.slane %v2544_v10, %v4012_v8  ;;  %v1616_v17 = vperm.slane %v1610_v9, %v4012_v8  ;;  %v1622_v58 = vsel %vm521_vm1, %v1621_v11, %v4242_v15  ;;  %v2536_v1 = vperm.slane %v2530_v29, %v4012_v8 }
 0x256   : > { %v2542_v22 = vsel %vm521_vm1, %v2541_v51, %v2522_v46  ;;  %v2559_v19 = vrot.slane %v2540_v47, 4  ;;  %v1628_v26 = vperm.slane %v1622_v58, %v4012_v8  ;;  %v1635_v63 = vrot.slane %v1620_v36, 4 }
 0x257   : > { %v2548_v31 = vperm.slane %v2542_v22, %v4012_v8  ;;  %v2557_v12 = vrot.slane %v2552_v32, 4  ;;  %v1633_v33 = vrot.slane %v1616_v17, 4  ;;  %v2555_v27 = vrot.slane %v2536_v1, 4 }
 0x258   : > { %v2560_v14 = vsel %vm521_vm1, %v2552_v32, %v2559_v19  ;;  %v1637_v15 = vrot.slane %v1628_v26, 4  ;;  %v1639_v43 = vrot.slane %v1632_v55, 4  ;;  %v1636_v49 = vsel %vm521_vm1, 0.0, %v1635_v63 }
 0x259   : > { %v2553_v60 = vrot.slane %v2548_v31, 4  ;;  %v2558_v62 = vsel %vm521_vm1, %v2557_v12, %v2540_v47  ;;  %2910 = vst.msk [vmem:[%s4131_s15 + $0x270] sm:$0xff] %vm2831_vm2, %v2560_v14  ;;  %v1634_v28 = vsel %vm521_vm1, 0.0, %v1633_v33  ;;  %v2556_v38 = vsel %vm521_vm1, %v2548_v31, %v2555_v27 }
 0x25a   : > { %2889 = vst.msk [vmem:[%s4131_s15 + $0x1c8] sm:$0xff] %vm2831_vm2, %v2558_v62  ;;  %v1638_v24 = vsel %vm521_vm1, 0.0, %v1637_v15  ;;  %v2723_v57 = vsel %vm521_vm1, %v1635_v63, %v1616_v17  ;;  %v1640_v3 = vsel %vm521_vm1, 0.0, %v1639_v43  ;;  %v2728_v44 = vrot.slane %v1636_v49, 4 }
 0x25b   : > { %v2554_v5 = vsel %vm521_vm1, %v2553_v60, %v2536_v1  ;;  %2868 = vst.msk [vmem:[%s4131_s15 + $0x120] sm:$0xff] %vm2831_vm2, %v2556_v38  ;;  %v2727_v2 = vperm.slane %v2723_v57, %v3771_v21  ;;  %v2734_v48 = vsel %vm521_vm1, %v1639_v43, %v1628_v26  ;;  %v2739_v50 = vrot.slane %v1640_v3, 4 }
 0x25c   : > { %2847 = vst.msk [vmem:[%s4131_s15 + $0x78] sm:$0xff] %vm2831_vm2, %v2554_v5  ;;  %v5466_v46 = vrot.slane %v5465_v4, 4  ;;  %v2729_v40 = vsel %vm521_vm1, %v2728_v44, %v1634_v28  ;;  %v2738_v61 = vperm.slane %v2734_v48, %v3771_v21  ;;  %v1548_v7 = vperm.slane %v1542_v52, %v3771_v21 }
 0x25d   : > { %v2747_v53 = vrot.slane %v2727_v2, 4  ;;  %v1567_v16 = vrot.slane %v4161_v25, 4  ;;  %v2733_v45 = vperm.slane %v2729_v40, %v3771_v21  ;;  %v2740_v59 = vsel %vm521_vm1, %v2739_v50, %v1638_v24 }
 0x25e   : > { %v1544_v6 = vsel %vm521_vm1, %v494_v30, %v5466_v46  ;;  %v2744_v0 = vperm.slane %v2740_v59, %v3771_v21  ;;  %v2759_v42 = vrot.slane %v2738_v61, 4  ;;  %v1553_v18 = vrot.slane %v1548_v7, 4 }
 0x25f   : > { %v1552_v34 = vperm.slane %v1544_v6, %v3771_v21  ;;  %v1556_v30 = vsel %vm521_vm1, %v1548_v7, %v1555_v37  ;;  %v2745_v54 = vrot.slane %v2733_v45, 4  ;;  %v2748_v13 = vsel %vm521_vm1, %v2733_v45, %v2747_v53 }
 0x260   : > { %v1564_v41 = vperm.slane %v1556_v30, %v4012_v8  ;;  %v2756_v11 = vperm.slane %v2748_v13, %v4012_v8  ;;  %v2757_v39 = vrot.slane %v2744_v0, 4  ;;  %v2760_v23 = vsel %vm521_vm1, %v2744_v0, %v2759_v42 }
 0x261   : > { %v1565_v20 = vrot.slane %v1552_v34, 4  ;;  %v1554_v36 = vsel %vm521_vm1, %v1553_v18, %v4148_v56  ;;  %v2746_v35 = vsel %vm521_vm1, %v2745_v54, %v2727_v2  ;;  %v2768_v37 = vperm.slane %v2760_v23, %v4012_v8 }
 0x262   : > { %v1560_v47 = vperm.slane %v1554_v36, %v4012_v8  ;;  %v2752_v10 = vperm.slane %v2746_v35, %v4012_v8  ;;  %v2758_v9 = vsel %vm521_vm1, %v2757_v39, %v2738_v61  ;;  %v2775_v29 = vrot.slane %v2756_v11, 4 }
 0x263   : > { %v1566_v51 = vsel %vm521_vm1, %v1565_v20, %v4161_v25  ;;  %v1568_v32 = vsel %vm521_vm1, %v1552_v34, %v1567_v16  ;;  %v2764_v56 = vperm.slane %v2758_v9, %v4012_v8  ;;  %v2773_v17 = vrot.slane %v2768_v37, 4 }
 0x264   : > { %v1572_v58 = vperm.slane %v1566_v51, %v4012_v8  ;;  %v1576_v1 = vperm.slane %v1568_v32, %v4012_v8  ;;  %v2771_v25 = vrot.slane %v2752_v10, 4  ;;  %v2776_v22 = vsel %vm521_vm1, %v2768_v37, %v2775_v29 }
 0x265   : > { %v1577_v19 = vrot.slane %v1560_v47, 4  ;;  %v1579_v26 = vrot.slane %v1564_v41, 4  ;;  %v2769_v31 = vrot.slane %v2764_v56, 4  ;;  %v2774_v12 = vsel %vm521_vm1, %v2773_v17, %v2756_v11  ;;  %2914 = vst.msk [vmem:[%s4131_s15 + $0x290] sm:$0xff] %vm2831_vm2, %v2776_v22 }
 0x266   : > { %v1581_v55 = vrot.slane %v1572_v58, 4  ;;  %v1583_v33 = vrot.slane %v1576_v1, 4  ;;  %v2772_v27 = vsel %vm521_vm1, %v2764_v56, %v2771_v25  ;;  %2893 = vst.msk [vmem:[%s4131_s15 + $0x1e8] sm:$0xff] %vm2831_vm2, %v2774_v12 }
 0x267   : > { %v1578_v14 = vsel %vm521_vm1, 0.0, %v1577_v19  ;;  %v1580_v63 = vsel %vm521_vm1, 0.0, %v1579_v26  ;;  %v2669_v15 = vsel %vm521_vm1, %v1579_v26, %v1560_v47  ;;  %v2770_v60 = vsel %vm521_vm1, %v2769_v31, %v2752_v10  ;;  %2872 = vst.msk [vmem:[%s4131_s15 + $0x140] sm:$0xff] %vm2831_vm2, %v2772_v27 }
 0x268   : > { %v1582_v62 = vsel %vm521_vm1, 0.0, %v1581_v55  ;;  %v1584_v28 = vsel %vm521_vm1, 0.0, %v1583_v33  ;;  %v2673_v43 = vperm.slane %v2669_v15, %v3771_v21  ;;  %2851 = vst.msk [vmem:[%s4131_s15 + $0x98] sm:$0xff] %vm2831_vm2, %v2770_v60  ;;  %v2674_v38 = vrot.slane %v1580_v63, 4 }
 0x269   : > { %v2680_v49 = vsel %vm521_vm1, %v1583_v33, %v1572_v58  ;;  %v2685_v24 = vrot.slane %v1584_v28, 4 }
 0x26a   : > { %v2684_v57 = vperm.slane %v2680_v49, %v3771_v21  ;;  %v2693_v5 = vrot.slane %v2673_v43, 4  ;;  %v2675_v3 = vsel %vm521_vm1, %v2674_v38, %v1578_v14 }
 0x26b   : > { %v2686_v2 = vsel %vm521_vm1, %v2685_v24, %v1582_v62  ;;  %v2679_v44 = vperm.slane %v2675_v3, %v3771_v21 }
 0x26c   : > { %v2690_v48 = vperm.slane %v2686_v2, %v3771_v21  ;;  %v2705_v50 = vrot.slane %v2684_v57, 4 }
 0x26d   : > { %v2691_v4 = vrot.slane %v2679_v44, 4  ;;  %v2694_v52 = vsel %vm521_vm1, %v2679_v44, %v2693_v5 }
 0x26e   : > { %v2703_v46 = vrot.slane %v2690_v48, 4  ;;  %v2706_v6 = vsel %vm521_vm1, %v2690_v48, %v2705_v50  ;;  %v2702_v40 = vperm.slane %v2694_v52, %v4012_v8 }
 0x26f   : > { %v2714_v61 = vperm.slane %v2706_v6, %v4012_v8  ;;  %v2692_v53 = vsel %vm521_vm1, %v2691_v4, %v2673_v43 }
 0x270   : > { %v2704_v21 = vsel %vm521_vm1, %v2703_v46, %v2684_v57  ;;  %v2698_v7 = vperm.slane %v2692_v53, %v4012_v8  ;;  %v2721_v59 = vrot.slane %v2702_v40, 4 }
 0x271   : > { %v2710_v16 = vperm.slane %v2704_v21, %v4012_v8  ;;  %v2719_v45 = vrot.slane %v2714_v61, 4 }
 0x272   : > { %v2717_v0 = vrot.slane %v2698_v7, 4  ;;  %v2722_v18 = vsel %vm521_vm1, %v2714_v61, %v2721_v59 }
 0x273   : > { %v2715_v34 = vrot.slane %v2710_v16, 4  ;;  %v2720_v42 = vsel %vm521_vm1, %v2719_v45, %v2702_v40  ;;  %2913 = vst.msk [vmem:[%s4131_s15 + $0x288] sm:$0xff] %vm2831_vm2, %v2722_v18 }
 0x274   : > { %2892 = vst.msk [vmem:[%s4131_s15 + $0x1e0] sm:$0xff] %vm2831_vm2, %v2720_v42  ;;  %v2718_v8 = vsel %vm521_vm1, %v2710_v16, %v2717_v0 }
 0x275   : > { %v2716_v30 = vsel %vm521_vm1, %v2715_v34, %v2698_v7  ;;  %2871 = vst.msk [vmem:[%s4131_s15 + $0x138] sm:$0xff] %vm2831_vm2, %v2718_v8 }
 0x276   : > { %2850 = vst.msk [vmem:[%s4131_s15 + $0x90] sm:$0xff] %vm2831_vm2, %v2716_v30 }
 0x277   : > { %3167 = shalt.err (!%p3164_p10)
}
 0x278   : > { %s3251_s12 = smov 128   ;;  %s3252_s20 = smov 8  }
 0x279   : > { %3055 = dma.vmem_to_hbm [thread:$0]  (%p3327_p9), %s2933_s30, 10752, %s2935_s29, %s2917_s2, %s3251_s12, %s3251_s12, %s3252_s20  }
 0x27a PF: > { %p3061_p11 = scmp.ge.s32.totalorder %s3238_s13, 2  ;;  %s2949_s27 = sand.u32 1, %s3210_s6  }
 0x27b   : > { %s2950_s15 = scalar_lea.sflag [#allocation4], %s2949_s27 }
 0x27c   : > { %p3058_p13 = pnand %p3061_p11, %p3334_p12 }
 0x27e   : > { %p3059_p0 = pneg %p3058_p13 }
 0x280   : > { %3205 = dma.done.wait (%p3059_p0), %s2950_s15, 10752  }
 0x281   : > { %3207 = vsyncadd (%p3059_p0), %s2950_s15, 4294956544  ;;  %s17_s13 = sadd.s32 1, %s3238_s13   ;;  %s5467_s10 = sld [smem:[#allocation11_spill]] }
 0x282   : > { %p14_p1 = scmp.ge.s32.totalorder %s17_s13, 10   ;;  %s5468_s21 = sld [smem:[#allocation12_spill]] }
 0x283   : > { %s5469_s12 = sld [smem:[#allocation13_spill]]  ;;  %s5470_s6 = smov %s3214_s7 }
 0x284   : > { %s5471_s7 = smov %s3218_s8  ;;  %s5472_s8 = smov %s3339_s26 }
 0x285   : > { %s5473_s9 = smov %s3230_s11  ;;  %16 = sbr.rel (!%p14_p1) target bundleno = 7 (0x7), region = 74 }
 0x288   : > { %s5474_s11 = smov %s5468_s21 }
 0x28a   :  { %2956 = vsyncpa [#allocation3], 1 }
 0x28b   :  { %2958 = vsyncpa [#allocation3 + $0x1], 1 }
 0x28c   :  { %2959 = vsyncpa [#allocation4], 1 }
 0x28d   :  { %2961 = vsyncpa [#allocation4 + $0x1], 1 }

</bundles_post_ra>
